<compile_context>
chip_gen: v7x
topology: tpu7x:2x2x1
jax: 0.10.0
libtpu: 0.0.40
codegen_flags: <defaults>
</compile_context>

<pallas_src>
import functools

import jax
import jax.numpy as jnp
from jax.experimental import pallas as pl
from jax.experimental.pallas import tpu as pltpu


def _fasttext_kernel(ids_ref, emb_ref, w_ref, bias_ref, out_ref, pooled_ref,
                     *, tb, seq_len):
    """One batch tile: gather+max-pool (unrolled) then a single MXU matmul.

    ids_ref : SMEM (B_pad, S) int32 (scalar-prefetched token ids)
    emb_ref : VMEM (V, 1, Hp) f32 embedding table (fully resident)
    w_ref   : VMEM (Hp, Cp) f32 classifier weight
    bias_ref: VMEM (1, Cp) f32 classifier bias
    out_ref : VMEM (TB, Cp) f32 logits block
    pooled_ref: VMEM (TB, Hp) f32 scratch (max-pooled embeddings)
    """
    b = pl.program_id(0)

    # Fused embedding gather + max pooling over the (static) sequence.
    # Fully unrolled: TB * S dynamic (1, Hp) row loads + VPU maxima.
    for r in range(tb):
        tok0 = ids_ref[b * tb + r, 0]
        row_max = emb_ref[tok0]                      # (1, Hp) f32
        for s in range(1, seq_len):
            tok = ids_ref[b * tb + r, s]
            row_max = jnp.maximum(row_max, emb_ref[tok])
        pooled_ref[pl.ds(r, 1), :] = row_max

    # Batched classifier: one (TB, Hp) @ (Hp, Cp) matmul on the MXU,
    # full-tile (TB, Cp) unmasked output store.
    logits = jnp.dot(pooled_ref[...], w_ref[...],
                     preferred_element_type=jnp.float32)
    out_ref[...] = logits + bias_ref[...]            # (1, Cp) bias broadcasts


def torch_model_forward(ids, emb_table, w, bias, *, batch_tile=8):
    """fast_text forward: logits = Linear(max_over_seq(Embedding(ids))).

    ids:       (B, S) int32 token ids (clamped to [0, V) for safety).
    emb_table: (V, Hp) f32 lane-padded embedding table.
    w:         (Hp, Cp) f32 lane-padded classifier weight.
    bias:      (1, Cp) f32 lane-padded classifier bias.
    Returns (B, Cp) f32 padded logits; slice [:, :class_num] outside.
    """
    B, S = ids.shape
    V, Hp = emb_table.shape
    Cp = w.shape[1]
    TB = batch_tile

    # Clamp token ids (torch.nn.Embedding would raise on OOB; we stay safe).
    ids = jnp.clip(ids.astype(jnp.int32), 0, V - 1)

    # Pad the batch to a sublane-dense multiple of TB; padded rows use token 0
    # and their outputs are sliced off below.
    B_pad = ((B + TB - 1) // TB) * TB
    if B_pad != B:
        ids = jnp.pad(ids, ((0, B_pad - B), (0, 0)))

    # (V, 1, Hp) view so the in-kernel gather is a dynamic index on a leading
    # (untiled) axis — the robust lowering path for row gathers from VMEM.
    emb3 = emb_table.reshape(V, 1, Hp)

    kernel = functools.partial(_fasttext_kernel, tb=TB, seq_len=S)

    out = pl.pallas_call(
        kernel,
        out_shape=jax.ShapeDtypeStruct((B_pad, Cp), jnp.float32),
        grid_spec=pltpu.PrefetchScalarGridSpec(
            num_scalar_prefetch=1,                       # ids -> SMEM
            grid=(B_pad // TB,),
            in_specs=[
                # Whole embedding table resident in VMEM (constant block idx,
                # fetched once, reused across all grid steps).
                pl.BlockSpec((V, 1, Hp), lambda b, ids_sm: (0, 0, 0)),
                pl.BlockSpec((Hp, Cp), lambda b, ids_sm: (0, 0)),
                pl.BlockSpec((1, Cp), lambda b, ids_sm: (0, 0)),
            ],
            out_specs=pl.BlockSpec((TB, Cp), lambda b, ids_sm: (b, 0)),
            scratch_shapes=[pltpu.VMEM((TB, Hp), jnp.float32)],
        ),
        compiler_params=pltpu.CompilerParams(
            dimension_semantics=("parallel",),
        ),
    )(ids, emb3, w, bias)
    return out[:B]


if __name__ == "__main__":
    # config = dict(hidden_size=32, vocab_size=64, class_num=4,
    #               model_type='fast_text', num_layers=1, pooling_style='max')
    hidden_size = 32
    vocab_size = 64 + 1            # vocab_size + 1 as in the module, padding_idx=0
    class_num = 4
    B, S = 2, 8

    H_PAD = 128                    # lane-dense hidden
    C_PAD = 128                    # lane-dense classes

    key = jax.random.PRNGKey(0)
    k_ids, k_emb, k_w, k_b = jax.random.split(key, 4)

    # Deterministic synthetic parameters (no checkpoint).
    emb = 0.1 * jax.random.normal(k_emb, (vocab_size, hidden_size), jnp.float32)
    emb = emb.at[0].set(0.0)       # padding_idx=0 -> zero row
    w = 0.1 * jax.random.normal(k_w, (hidden_size, class_num), jnp.float32)
    bias = 0.1 * jax.random.normal(k_b, (1, class_num), jnp.float32)

    # Lane-dense f32 parameter layout for the kernel (padded lanes/rows are 0).
    emb_p = jnp.zeros((vocab_size, H_PAD), jnp.float32).at[:, :hidden_size].set(emb)
    w_p = jnp.zeros((H_PAD, C_PAD), jnp.float32).at[:hidden_size, :class_num].set(w)
    bias_p = jnp.zeros((1, C_PAD), jnp.float32).at[:, :class_num].set(bias)

    ids = jax.random.randint(k_ids, (B, S), 0, vocab_size, dtype=jnp.int32)

    logits = torch_model_forward(ids, emb_p, w_p, bias_p)[:, :class_num]
    jax.block_until_ready(logits)

    # Pure-JAX reference of the same forward semantics.
    pooled_ref = jnp.max(jnp.take(emb_p, ids, axis=0), axis=1)        # (B, H_PAD)
    ref = (pooled_ref @ w_p + bias_p)[:, :class_num]

    assert logits.shape == (B, class_num)
    assert jnp.allclose(logits, ref, atol=1e-4, rtol=1e-4), "mismatch vs reference"

    # TODO(synk): 'bert' / 'bert_lstm' encoder branches (pretrained BertModel +
    # LSTM), 'avg' pooling_style, and the cross-entropy training path are not
    # reproduced; only the fast_text + max-pool inference path is implemented.
    print("KERNEL_OK")
</pallas_src>

<mosaic_0001>
module attributes {stable_mosaic.version = 11 : i64} {
  func.func @_fasttext_kernel(%arg0: i32, %arg1: memref<8x8xi32, #tpu.memory_space<smem>>, %arg2: memref<65x1x128xf32, #tpu.memory_space<vmem>>, %arg3: memref<128x128xf32, #tpu.memory_space<vmem>>, %arg4: memref<1x128xf32, #tpu.memory_space<vmem>>, %arg5: memref<8x128xf32, #tpu.memory_space<vmem>>, %arg6: memref<8x128xf32, #tpu.memory_space<vmem>>) attributes {dimension_semantics = [#tpu.dimension_semantics<parallel>], iteration_bounds = array<i64: 1>, scalar_prefetch = 1 : i64, scratch_operands = 1 : i64, tpu.core_type = #tpu.core_type<tc>, window_params = [{pipeline_mode = #tpu.pipeline_mode<synchronous>, transform_indices = @transform_0, window_bounds = array<i64: 65, 1, 128>}, {pipeline_mode = #tpu.pipeline_mode<synchronous>, transform_indices = @transform_1, window_bounds = array<i64: 128, 128>}, {pipeline_mode = #tpu.pipeline_mode<synchronous>, transform_indices = @transform_2, window_bounds = array<i64: 1, 128>}, {transform_indices = @transform_3, window_bounds = array<i64: 8, 128>}]} {
    %c8_i32 = arith.constant 8 : i32
    %0 = arith.muli %arg0, %c8_i32 : i32
    %c0_i32 = arith.constant 0 : i32
    %1 = arith.addi %0, %c0_i32 : i32
    %2 = arith.index_cast %1 : i32 to index
    %c0 = arith.constant 0 : index
    %3 = memref.load %arg1[%2, %c0] : memref<8x8xi32, #tpu.memory_space<smem>>
    %4 = arith.index_cast %3 : i32 to index
    %c0_0 = arith.constant 0 : index
    %c0_1 = arith.constant 0 : index
    %5 = vector.load %arg2[%4, %c0_0, %c0_1] : memref<65x1x128xf32, #tpu.memory_space<vmem>>, vector<1x1x128xf32>
    %6 = vector.shape_cast %5 : vector<1x1x128xf32> to vector<1x128xf32>
    %c8_i32_2 = arith.constant 8 : i32
    %7 = arith.muli %arg0, %c8_i32_2 : i32
    %c0_i32_3 = arith.constant 0 : i32
    %8 = arith.addi %7, %c0_i32_3 : i32
    %9 = arith.index_cast %8 : i32 to index
    %c1 = arith.constant 1 : index
    %10 = memref.load %arg1[%9, %c1] : memref<8x8xi32, #tpu.memory_space<smem>>
    %11 = arith.index_cast %10 : i32 to index
    %c0_4 = arith.constant 0 : index
    %c0_5 = arith.constant 0 : index
    %12 = vector.load %arg2[%11, %c0_4, %c0_5] : memref<65x1x128xf32, #tpu.memory_space<vmem>>, vector<1x1x128xf32>
    %13 = vector.shape_cast %12 : vector<1x1x128xf32> to vector<1x128xf32>
    %14 = arith.maximumf %6, %13 : vector<1x128xf32>
    %c8_i32_6 = arith.constant 8 : i32
    %15 = arith.muli %arg0, %c8_i32_6 : i32
    %c0_i32_7 = arith.constant 0 : i32
    %16 = arith.addi %15, %c0_i32_7 : i32
    %17 = arith.index_cast %16 : i32 to index
    %c2 = arith.constant 2 : index
    %18 = memref.load %arg1[%17, %c2] : memref<8x8xi32, #tpu.memory_space<smem>>
    %19 = arith.index_cast %18 : i32 to index
    %c0_8 = arith.constant 0 : index
    %c0_9 = arith.constant 0 : index
    %20 = vector.load %arg2[%19, %c0_8, %c0_9] : memref<65x1x128xf32, #tpu.memory_space<vmem>>, vector<1x1x128xf32>
    %21 = vector.shape_cast %20 : vector<1x1x128xf32> to vector<1x128xf32>
    %22 = arith.maximumf %14, %21 : vector<1x128xf32>
    %c8_i32_10 = arith.constant 8 : i32
    %23 = arith.muli %arg0, %c8_i32_10 : i32
    %c0_i32_11 = arith.constant 0 : i32
    %24 = arith.addi %23, %c0_i32_11 : i32
    %25 = arith.index_cast %24 : i32 to index
    %c3 = arith.constant 3 : index
    %26 = memref.load %arg1[%25, %c3] : memref<8x8xi32, #tpu.memory_space<smem>>
    %27 = arith.index_cast %26 : i32 to index
    %c0_12 = arith.constant 0 : index
    %c0_13 = arith.constant 0 : index
    %28 = vector.load %arg2[%27, %c0_12, %c0_13] : memref<65x1x128xf32, #tpu.memory_space<vmem>>, vector<1x1x128xf32>
    %29 = vector.shape_cast %28 : vector<1x1x128xf32> to vector<1x128xf32>
    %30 = arith.maximumf %22, %29 : vector<1x128xf32>
    %c8_i32_14 = arith.constant 8 : i32
    %31 = arith.muli %arg0, %c8_i32_14 : i32
    %c0_i32_15 = arith.constant 0 : i32
    %32 = arith.addi %31, %c0_i32_15 : i32
    %33 = arith.index_cast %32 : i32 to index
    %c4 = arith.constant 4 : index
    %34 = memref.load %arg1[%33, %c4] : memref<8x8xi32, #tpu.memory_space<smem>>
    %35 = arith.index_cast %34 : i32 to index
    %c0_16 = arith.constant 0 : index
    %c0_17 = arith.constant 0 : index
    %36 = vector.load %arg2[%35, %c0_16, %c0_17] : memref<65x1x128xf32, #tpu.memory_space<vmem>>, vector<1x1x128xf32>
    %37 = vector.shape_cast %36 : vector<1x1x128xf32> to vector<1x128xf32>
    %38 = arith.maximumf %30, %37 : vector<1x128xf32>
    %c8_i32_18 = arith.constant 8 : i32
    %39 = arith.muli %arg0, %c8_i32_18 : i32
    %c0_i32_19 = arith.constant 0 : i32
    %40 = arith.addi %39, %c0_i32_19 : i32
    %41 = arith.index_cast %40 : i32 to index
    %c5 = arith.constant 5 : index
    %42 = memref.load %arg1[%41, %c5] : memref<8x8xi32, #tpu.memory_space<smem>>
    %43 = arith.index_cast %42 : i32 to index
    %c0_20 = arith.constant 0 : index
    %c0_21 = arith.constant 0 : index
    %44 = vector.load %arg2[%43, %c0_20, %c0_21] : memref<65x1x128xf32, #tpu.memory_space<vmem>>, vector<1x1x128xf32>
    %45 = vector.shape_cast %44 : vector<1x1x128xf32> to vector<1x128xf32>
    %46 = arith.maximumf %38, %45 : vector<1x128xf32>
    %c8_i32_22 = arith.constant 8 : i32
    %47 = arith.muli %arg0, %c8_i32_22 : i32
    %c0_i32_23 = arith.constant 0 : i32
    %48 = arith.addi %47, %c0_i32_23 : i32
    %49 = arith.index_cast %48 : i32 to index
    %c6 = arith.constant 6 : index
    %50 = memref.load %arg1[%49, %c6] : memref<8x8xi32, #tpu.memory_space<smem>>
    %51 = arith.index_cast %50 : i32 to index
    %c0_24 = arith.constant 0 : index
    %c0_25 = arith.constant 0 : index
    %52 = vector.load %arg2[%51, %c0_24, %c0_25] : memref<65x1x128xf32, #tpu.memory_space<vmem>>, vector<1x1x128xf32>
    %53 = vector.shape_cast %52 : vector<1x1x128xf32> to vector<1x128xf32>
    %54 = arith.maximumf %46, %53 : vector<1x128xf32>
    %c8_i32_26 = arith.constant 8 : i32
    %55 = arith.muli %arg0, %c8_i32_26 : i32
    %c0_i32_27 = arith.constant 0 : i32
    %56 = arith.addi %55, %c0_i32_27 : i32
    %57 = arith.index_cast %56 : i32 to index
    %c7 = arith.constant 7 : index
    %58 = memref.load %arg1[%57, %c7] : memref<8x8xi32, #tpu.memory_space<smem>>
    %59 = arith.index_cast %58 : i32 to index
    %c0_28 = arith.constant 0 : index
    %c0_29 = arith.constant 0 : index
    %60 = vector.load %arg2[%59, %c0_28, %c0_29] : memref<65x1x128xf32, #tpu.memory_space<vmem>>, vector<1x1x128xf32>
    %61 = vector.shape_cast %60 : vector<1x1x128xf32> to vector<1x128xf32>
    %62 = arith.maximumf %54, %61 : vector<1x128xf32>
    %c0_30 = arith.constant 0 : index
    %c0_31 = arith.constant 0 : index
    %63 = vector.load %arg6[%c0_30, %c0_31] : memref<8x128xf32, #tpu.memory_space<vmem>>, vector<1x128xf32>
    tpu.vector_store %arg6[%c0_30, %c0_31], %62 {strides = array<i32>} : memref<8x128xf32, #tpu.memory_space<vmem>>, vector<1x128xf32>,
    %c8_i32_32 = arith.constant 8 : i32
    %64 = arith.muli %arg0, %c8_i32_32 : i32
    %c1_i32 = arith.constant 1 : i32
    %65 = arith.addi %64, %c1_i32 : i32
    %66 = arith.index_cast %65 : i32 to index
    %c0_33 = arith.constant 0 : index
    %67 = memref.load %arg1[%66, %c0_33] : memref<8x8xi32, #tpu.memory_space<smem>>
    %68 = arith.index_cast %67 : i32 to index
    %c0_34 = arith.constant 0 : index
    %c0_35 = arith.constant 0 : index
    %69 = vector.load %arg2[%68, %c0_34, %c0_35] : memref<65x1x128xf32, #tpu.memory_space<vmem>>, vector<1x1x128xf32>
    %70 = vector.shape_cast %69 : vector<1x1x128xf32> to vector<1x128xf32>
    %c8_i32_36 = arith.constant 8 : i32
    %71 = arith.muli %arg0, %c8_i32_36 : i32
    %c1_i32_37 = arith.constant 1 : i32
    %72 = arith.addi %71, %c1_i32_37 : i32
    %73 = arith.index_cast %72 : i32 to index
    %c1_38 = arith.constant 1 : index
    %74 = memref.load %arg1[%73, %c1_38] : memref<8x8xi32, #tpu.memory_space<smem>>
    %75 = arith.index_cast %74 : i32 to index
    %c0_39 = arith.constant 0 : index
    %c0_40 = arith.constant 0 : index
    %76 = vector.load %arg2[%75, %c0_39, %c0_40] : memref<65x1x128xf32, #tpu.memory_space<vmem>>, vector<1x1x128xf32>
    %77 = vector.shape_cast %76 : vector<1x1x128xf32> to vector<1x128xf32>
    %78 = arith.maximumf %70, %77 : vector<1x128xf32>
    %c8_i32_41 = arith.constant 8 : i32
    %79 = arith.muli %arg0, %c8_i32_41 : i32
    %c1_i32_42 = arith.constant 1 : i32
    %80 = arith.addi %79, %c1_i32_42 : i32
    %81 = arith.index_cast %80 : i32 to index
    %c2_43 = arith.constant 2 : index
    %82 = memref.load %arg1[%81, %c2_43] : memref<8x8xi32, #tpu.memory_space<smem>>
    %83 = arith.index_cast %82 : i32 to index
    %c0_44 = arith.constant 0 : index
    %c0_45 = arith.constant 0 : index
    %84 = vector.load %arg2[%83, %c0_44, %c0_45] : memref<65x1x128xf32, #tpu.memory_space<vmem>>, vector<1x1x128xf32>
    %85 = vector.shape_cast %84 : vector<1x1x128xf32> to vector<1x128xf32>
    %86 = arith.maximumf %78, %85 : vector<1x128xf32>
    %c8_i32_46 = arith.constant 8 : i32
    %87 = arith.muli %arg0, %c8_i32_46 : i32
    %c1_i32_47 = arith.constant 1 : i32
    %88 = arith.addi %87, %c1_i32_47 : i32
    %89 = arith.index_cast %88 : i32 to index
    %c3_48 = arith.constant 3 : index
    %90 = memref.load %arg1[%89, %c3_48] : memref<8x8xi32, #tpu.memory_space<smem>>
    %91 = arith.index_cast %90 : i32 to index
    %c0_49 = arith.constant 0 : index
    %c0_50 = arith.constant 0 : index
    %92 = vector.load %arg2[%91, %c0_49, %c0_50] : memref<65x1x128xf32, #tpu.memory_space<vmem>>, vector<1x1x128xf32>
    %93 = vector.shape_cast %92 : vector<1x1x128xf32> to vector<1x128xf32>
    %94 = arith.maximumf %86, %93 : vector<1x128xf32>
    %c8_i32_51 = arith.constant 8 : i32
    %95 = arith.muli %arg0, %c8_i32_51 : i32
    %c1_i32_52 = arith.constant 1 : i32
    %96 = arith.addi %95, %c1_i32_52 : i32
    %97 = arith.index_cast %96 : i32 to index
    %c4_53 = arith.constant 4 : index
    %98 = memref.load %arg1[%97, %c4_53] : memref<8x8xi32, #tpu.memory_space<smem>>
    %99 = arith.index_cast %98 : i32 to index
    %c0_54 = arith.constant 0 : index
    %c0_55 = arith.constant 0 : index
    %100 = vector.load %arg2[%99, %c0_54, %c0_55] : memref<65x1x128xf32, #tpu.memory_space<vmem>>, vector<1x1x128xf32>
    %101 = vector.shape_cast %100 : vector<1x1x128xf32> to vector<1x128xf32>
    %102 = arith.maximumf %94, %101 : vector<1x128xf32>
    %c8_i32_56 = arith.constant 8 : i32
    %103 = arith.muli %arg0, %c8_i32_56 : i32
    %c1_i32_57 = arith.constant 1 : i32
    %104 = arith.addi %103, %c1_i32_57 : i32
    %105 = arith.index_cast %104 : i32 to index
    %c5_58 = arith.constant 5 : index
    %106 = memref.load %arg1[%105, %c5_58] : memref<8x8xi32, #tpu.memory_space<smem>>
    %107 = arith.index_cast %106 : i32 to index
    %c0_59 = arith.constant 0 : index
    %c0_60 = arith.constant 0 : index
    %108 = vector.load %arg2[%107, %c0_59, %c0_60] : memref<65x1x128xf32, #tpu.memory_space<vmem>>, vector<1x1x128xf32>
    %109 = vector.shape_cast %108 : vector<1x1x128xf32> to vector<1x128xf32>
    %110 = arith.maximumf %102, %109 : vector<1x128xf32>
    %c8_i32_61 = arith.constant 8 : i32
    %111 = arith.muli %arg0, %c8_i32_61 : i32
    %c1_i32_62 = arith.constant 1 : i32
    %112 = arith.addi %111, %c1_i32_62 : i32
    %113 = arith.index_cast %112 : i32 to index
    %c6_63 = arith.constant 6 : index
    %114 = memref.load %arg1[%113, %c6_63] : memref<8x8xi32, #tpu.memory_space<smem>>
    %115 = arith.index_cast %114 : i32 to index
    %c0_64 = arith.constant 0 : index
    %c0_65 = arith.constant 0 : index
    %116 = vector.load %arg2[%115, %c0_64, %c0_65] : memref<65x1x128xf32, #tpu.memory_space<vmem>>, vector<1x1x128xf32>
    %117 = vector.shape_cast %116 : vector<1x1x128xf32> to vector<1x128xf32>
    %118 = arith.maximumf %110, %117 : vector<1x128xf32>
    %c8_i32_66 = arith.constant 8 : i32
    %119 = arith.muli %arg0, %c8_i32_66 : i32
    %c1_i32_67 = arith.constant 1 : i32
    %120 = arith.addi %119, %c1_i32_67 : i32
    %121 = arith.index_cast %120 : i32 to index
    %c7_68 = arith.constant 7 : index
    %122 = memref.load %arg1[%121, %c7_68] : memref<8x8xi32, #tpu.memory_space<smem>>
    %123 = arith.index_cast %122 : i32 to index
    %c0_69 = arith.constant 0 : index
    %c0_70 = arith.constant 0 : index
    %124 = vector.load %arg2[%123, %c0_69, %c0_70] : memref<65x1x128xf32, #tpu.memory_space<vmem>>, vector<1x1x128xf32>
    %125 = vector.shape_cast %124 : vector<1x1x128xf32> to vector<1x128xf32>
    %126 = arith.maximumf %118, %125 : vector<1x128xf32>
    %c1_71 = arith.constant 1 : index
    %c0_72 = arith.constant 0 : index
    %127 = vector.load %arg6[%c1_71, %c0_72] : memref<8x128xf32, #tpu.memory_space<vmem>>, vector<1x128xf32>
    tpu.vector_store %arg6[%c1_71, %c0_72], %126 {strides = array<i32>} : memref<8x128xf32, #tpu.memory_space<vmem>>, vector<1x128xf32>,
    %c8_i32_73 = arith.constant 8 : i32
    %128 = arith.muli %arg0, %c8_i32_73 : i32
    %c2_i32 = arith.constant 2 : i32
    %129 = arith.addi %128, %c2_i32 : i32
    %130 = arith.index_cast %129 : i32 to index
    %c0_74 = arith.constant 0 : index
    %131 = memref.load %arg1[%130, %c0_74] : memref<8x8xi32, #tpu.memory_space<smem>>
    %132 = arith.index_cast %131 : i32 to index
    %c0_75 = arith.constant 0 : index
    %c0_76 = arith.constant 0 : index
    %133 = vector.load %arg2[%132, %c0_75, %c0_76] : memref<65x1x128xf32, #tpu.memory_space<vmem>>, vector<1x1x128xf32>
    %134 = vector.shape_cast %133 : vector<1x1x128xf32> to vector<1x128xf32>
    %c8_i32_77 = arith.constant 8 : i32
    %135 = arith.muli %arg0, %c8_i32_77 : i32
    %c2_i32_78 = arith.constant 2 : i32
    %136 = arith.addi %135, %c2_i32_78 : i32
    %137 = arith.index_cast %136 : i32 to index
    %c1_79 = arith.constant 1 : index
    %138 = memref.load %arg1[%137, %c1_79] : memref<8x8xi32, #tpu.memory_space<smem>>
    %139 = arith.index_cast %138 : i32 to index
    %c0_80 = arith.constant 0 : index
    %c0_81 = arith.constant 0 : index
    %140 = vector.load %arg2[%139, %c0_80, %c0_81] : memref<65x1x128xf32, #tpu.memory_space<vmem>>, vector<1x1x128xf32>
    %141 = vector.shape_cast %140 : vector<1x1x128xf32> to vector<1x128xf32>
    %142 = arith.maximumf %134, %141 : vector<1x128xf32>
    %c8_i32_82 = arith.constant 8 : i32
    %143 = arith.muli %arg0, %c8_i32_82 : i32
    %c2_i32_83 = arith.constant 2 : i32
    %144 = arith.addi %143, %c2_i32_83 : i32
    %145 = arith.index_cast %144 : i32 to index
    %c2_84 = arith.constant 2 : index
    %146 = memref.load %arg1[%145, %c2_84] : memref<8x8xi32, #tpu.memory_space<smem>>
    %147 = arith.index_cast %146 : i32 to index
    %c0_85 = arith.constant 0 : index
    %c0_86 = arith.constant 0 : index
    %148 = vector.load %arg2[%147, %c0_85, %c0_86] : memref<65x1x128xf32, #tpu.memory_space<vmem>>, vector<1x1x128xf32>
    %149 = vector.shape_cast %148 : vector<1x1x128xf32> to vector<1x128xf32>
    %150 = arith.maximumf %142, %149 : vector<1x128xf32>
    %c8_i32_87 = arith.constant 8 : i32
    %151 = arith.muli %arg0, %c8_i32_87 : i32
    %c2_i32_88 = arith.constant 2 : i32
    %152 = arith.addi %151, %c2_i32_88 : i32
    %153 = arith.index_cast %152 : i32 to index
    %c3_89 = arith.constant 3 : index
    %154 = memref.load %arg1[%153, %c3_89] : memref<8x8xi32, #tpu.memory_space<smem>>
    %155 = arith.index_cast %154 : i32 to index
    %c0_90 = arith.constant 0 : index
    %c0_91 = arith.constant 0 : index
    %156 = vector.load %arg2[%155, %c0_90, %c0_91] : memref<65x1x128xf32, #tpu.memory_space<vmem>>, vector<1x1x128xf32>
    %157 = vector.shape_cast %156 : vector<1x1x128xf32> to vector<1x128xf32>
    %158 = arith.maximumf %150, %157 : vector<1x128xf32>
    %c8_i32_92 = arith.constant 8 : i32
    %159 = arith.muli %arg0, %c8_i32_92 : i32
    %c2_i32_93 = arith.constant 2 : i32
    %160 = arith.addi %159, %c2_i32_93 : i32
    %161 = arith.index_cast %160 : i32 to index
    %c4_94 = arith.constant 4 : index
    %162 = memref.load %arg1[%161, %c4_94] : memref<8x8xi32, #tpu.memory_space<smem>>
    %163 = arith.index_cast %162 : i32 to index
    %c0_95 = arith.constant 0 : index
    %c0_96 = arith.constant 0 : index
    %164 = vector.load %arg2[%163, %c0_95, %c0_96] : memref<65x1x128xf32, #tpu.memory_space<vmem>>, vector<1x1x128xf32>
    %165 = vector.shape_cast %164 : vector<1x1x128xf32> to vector<1x128xf32>
    %166 = arith.maximumf %158, %165 : vector<1x128xf32>
    %c8_i32_97 = arith.constant 8 : i32
    %167 = arith.muli %arg0, %c8_i32_97 : i32
    %c2_i32_98 = arith.constant 2 : i32
    %168 = arith.addi %167, %c2_i32_98 : i32
    %169 = arith.index_cast %168 : i32 to index
    %c5_99 = arith.constant 5 : index
    %170 = memref.load %arg1[%169, %c5_99] : memref<8x8xi32, #tpu.memory_space<smem>>
    %171 = arith.index_cast %170 : i32 to index
    %c0_100 = arith.constant 0 : index
    %c0_101 = arith.constant 0 : index
    %172 = vector.load %arg2[%171, %c0_100, %c0_101] : memref<65x1x128xf32, #tpu.memory_space<vmem>>, vector<1x1x128xf32>
    %173 = vector.shape_cast %172 : vector<1x1x128xf32> to vector<1x128xf32>
    %174 = arith.maximumf %166, %173 : vector<1x128xf32>
    %c8_i32_102 = arith.constant 8 : i32
    %175 = arith.muli %arg0, %c8_i32_102 : i32
    %c2_i32_103 = arith.constant 2 : i32
    %176 = arith.addi %175, %c2_i32_103 : i32
    %177 = arith.index_cast %176 : i32 to index
    %c6_104 = arith.constant 6 : index
    %178 = memref.load %arg1[%177, %c6_104] : memref<8x8xi32, #tpu.memory_space<smem>>
    %179 = arith.index_cast %178 : i32 to index
    %c0_105 = arith.constant 0 : index
    %c0_106 = arith.constant 0 : index
    %180 = vector.load %arg2[%179, %c0_105, %c0_106] : memref<65x1x128xf32, #tpu.memory_space<vmem>>, vector<1x1x128xf32>
    %181 = vector.shape_cast %180 : vector<1x1x128xf32> to vector<1x128xf32>
    %182 = arith.maximumf %174, %181 : vector<1x128xf32>
    %c8_i32_107 = arith.constant 8 : i32
    %183 = arith.muli %arg0, %c8_i32_107 : i32
    %c2_i32_108 = arith.constant 2 : i32
    %184 = arith.addi %183, %c2_i32_108 : i32
    %185 = arith.index_cast %184 : i32 to index
    %c7_109 = arith.constant 7 : index
    %186 = memref.load %arg1[%185, %c7_109] : memref<8x8xi32, #tpu.memory_space<smem>>
    %187 = arith.index_cast %186 : i32 to index
    %c0_110 = arith.constant 0 : index
    %c0_111 = arith.constant 0 : index
    %188 = vector.load %arg2[%187, %c0_110, %c0_111] : memref<65x1x128xf32, #tpu.memory_space<vmem>>, vector<1x1x128xf32>
    %189 = vector.shape_cast %188 : vector<1x1x128xf32> to vector<1x128xf32>
    %190 = arith.maximumf %182, %189 : vector<1x128xf32>
    %c2_112 = arith.constant 2 : index
    %c0_113 = arith.constant 0 : index
    %191 = vector.load %arg6[%c2_112, %c0_113] : memref<8x128xf32, #tpu.memory_space<vmem>>, vector<1x128xf32>
    tpu.vector_store %arg6[%c2_112, %c0_113], %190 {strides = array<i32>} : memref<8x128xf32, #tpu.memory_space<vmem>>, vector<1x128xf32>,
    %c8_i32_114 = arith.constant 8 : i32
    %192 = arith.muli %arg0, %c8_i32_114 : i32
    %c3_i32 = arith.constant 3 : i32
    %193 = arith.addi %192, %c3_i32 : i32
    %194 = arith.index_cast %193 : i32 to index
    %c0_115 = arith.constant 0 : index
    %195 = memref.load %arg1[%194, %c0_115] : memref<8x8xi32, #tpu.memory_space<smem>>
    %196 = arith.index_cast %195 : i32 to index
    %c0_116 = arith.constant 0 : index
    %c0_117 = arith.constant 0 : index
    %197 = vector.load %arg2[%196, %c0_116, %c0_117] : memref<65x1x128xf32, #tpu.memory_space<vmem>>, vector<1x1x128xf32>
    %198 = vector.shape_cast %197 : vector<1x1x128xf32> to vector<1x128xf32>
    %c8_i32_118 = arith.constant 8 : i32
    %199 = arith.muli %arg0, %c8_i32_118 : i32
    %c3_i32_119 = arith.constant 3 : i32
    %200 = arith.addi %199, %c3_i32_119 : i32
    %201 = arith.index_cast %200 : i32 to index
    %c1_120 = arith.constant 1 : index
    %202 = memref.load %arg1[%201, %c1_120] : memref<8x8xi32, #tpu.memory_space<smem>>
    %203 = arith.index_cast %202 : i32 to index
    %c0_121 = arith.constant 0 : index
    %c0_122 = arith.constant 0 : index
    %204 = vector.load %arg2[%203, %c0_121, %c0_122] : memref<65x1x128xf32, #tpu.memory_space<vmem>>, vector<1x1x128xf32>
    %205 = vector.shape_cast %204 : vector<1x1x128xf32> to vector<1x128xf32>
    %206 = arith.maximumf %198, %205 : vector<1x128xf32>
    %c8_i32_123 = arith.constant 8 : i32
    %207 = arith.muli %arg0, %c8_i32_123 : i32
    %c3_i32_124 = arith.constant 3 : i32
    %208 = arith.addi %207, %c3_i32_124 : i32
    %209 = arith.index_cast %208 : i32 to index
    %c2_125 = arith.constant 2 : index
    %210 = memref.load %arg1[%209, %c2_125] : memref<8x8xi32, #tpu.memory_space<smem>>
    %211 = arith.index_cast %210 : i32 to index
    %c0_126 = arith.constant 0 : index
    %c0_127 = arith.constant 0 : index
    %212 = vector.load %arg2[%211, %c0_126, %c0_127] : memref<65x1x128xf32, #tpu.memory_space<vmem>>, vector<1x1x128xf32>
    %213 = vector.shape_cast %212 : vector<1x1x128xf32> to vector<1x128xf32>
    %214 = arith.maximumf %206, %213 : vector<1x128xf32>
    %c8_i32_128 = arith.constant 8 : i32
    %215 = arith.muli %arg0, %c8_i32_128 : i32
    %c3_i32_129 = arith.constant 3 : i32
    %216 = arith.addi %215, %c3_i32_129 : i32
    %217 = arith.index_cast %216 : i32 to index
    %c3_130 = arith.constant 3 : index
    %218 = memref.load %arg1[%217, %c3_130] : memref<8x8xi32, #tpu.memory_space<smem>>
    %219 = arith.index_cast %218 : i32 to index
    %c0_131 = arith.constant 0 : index
    %c0_132 = arith.constant 0 : index
    %220 = vector.load %arg2[%219, %c0_131, %c0_132] : memref<65x1x128xf32, #tpu.memory_space<vmem>>, vector<1x1x128xf32>
    %221 = vector.shape_cast %220 : vector<1x1x128xf32> to vector<1x128xf32>
    %222 = arith.maximumf %214, %221 : vector<1x128xf32>
    %c8_i32_133 = arith.constant 8 : i32
    %223 = arith.muli %arg0, %c8_i32_133 : i32
    %c3_i32_134 = arith.constant 3 : i32
    %224 = arith.addi %223, %c3_i32_134 : i32
    %225 = arith.index_cast %224 : i32 to index
    %c4_135 = arith.constant 4 : index
    %226 = memref.load %arg1[%225, %c4_135] : memref<8x8xi32, #tpu.memory_space<smem>>
    %227 = arith.index_cast %226 : i32 to index
    %c0_136 = arith.constant 0 : index
    %c0_137 = arith.constant 0 : index
    %228 = vector.load %arg2[%227, %c0_136, %c0_137] : memref<65x1x128xf32, #tpu.memory_space<vmem>>, vector<1x1x128xf32>
    %229 = vector.shape_cast %228 : vector<1x1x128xf32> to vector<1x128xf32>
    %230 = arith.maximumf %222, %229 : vector<1x128xf32>
    %c8_i32_138 = arith.constant 8 : i32
    %231 = arith.muli %arg0, %c8_i32_138 : i32
    %c3_i32_139 = arith.constant 3 : i32
    %232 = arith.addi %231, %c3_i32_139 : i32
    %233 = arith.index_cast %232 : i32 to index
    %c5_140 = arith.constant 5 : index
    %234 = memref.load %arg1[%233, %c5_140] : memref<8x8xi32, #tpu.memory_space<smem>>
    %235 = arith.index_cast %234 : i32 to index
    %c0_141 = arith.constant 0 : index
    %c0_142 = arith.constant 0 : index
    %236 = vector.load %arg2[%235, %c0_141, %c0_142] : memref<65x1x128xf32, #tpu.memory_space<vmem>>, vector<1x1x128xf32>
    %237 = vector.shape_cast %236 : vector<1x1x128xf32> to vector<1x128xf32>
    %238 = arith.maximumf %230, %237 : vector<1x128xf32>
    %c8_i32_143 = arith.constant 8 : i32
    %239 = arith.muli %arg0, %c8_i32_143 : i32
    %c3_i32_144 = arith.constant 3 : i32
    %240 = arith.addi %239, %c3_i32_144 : i32
    %241 = arith.index_cast %240 : i32 to index
    %c6_145 = arith.constant 6 : index
    %242 = memref.load %arg1[%241, %c6_145] : memref<8x8xi32, #tpu.memory_space<smem>>
    %243 = arith.index_cast %242 : i32 to index
    %c0_146 = arith.constant 0 : index
    %c0_147 = arith.constant 0 : index
    %244 = vector.load %arg2[%243, %c0_146, %c0_147] : memref<65x1x128xf32, #tpu.memory_space<vmem>>, vector<1x1x128xf32>
    %245 = vector.shape_cast %244 : vector<1x1x128xf32> to vector<1x128xf32>
    %246 = arith.maximumf %238, %245 : vector<1x128xf32>
    %c8_i32_148 = arith.constant 8 : i32
    %247 = arith.muli %arg0, %c8_i32_148 : i32
    %c3_i32_149 = arith.constant 3 : i32
    %248 = arith.addi %247, %c3_i32_149 : i32
    %249 = arith.index_cast %248 : i32 to index
    %c7_150 = arith.constant 7 : index
    %250 = memref.load %arg1[%249, %c7_150] : memref<8x8xi32, #tpu.memory_space<smem>>
    %251 = arith.index_cast %250 : i32 to index
    %c0_151 = arith.constant 0 : index
    %c0_152 = arith.constant 0 : index
    %252 = vector.load %arg2[%251, %c0_151, %c0_152] : memref<65x1x128xf32, #tpu.memory_space<vmem>>, vector<1x1x128xf32>
    %253 = vector.shape_cast %252 : vector<1x1x128xf32> to vector<1x128xf32>
    %254 = arith.maximumf %246, %253 : vector<1x128xf32>
    %c3_153 = arith.constant 3 : index
    %c0_154 = arith.constant 0 : index
    %255 = vector.load %arg6[%c3_153, %c0_154] : memref<8x128xf32, #tpu.memory_space<vmem>>, vector<1x128xf32>
    tpu.vector_store %arg6[%c3_153, %c0_154], %254 {strides = array<i32>} : memref<8x128xf32, #tpu.memory_space<vmem>>, vector<1x128xf32>,
    %c8_i32_155 = arith.constant 8 : i32
    %256 = arith.muli %arg0, %c8_i32_155 : i32
    %c4_i32 = arith.constant 4 : i32
    %257 = arith.addi %256, %c4_i32 : i32
    %258 = arith.index_cast %257 : i32 to index
    %c0_156 = arith.constant 0 : index
    %259 = memref.load %arg1[%258, %c0_156] : memref<8x8xi32, #tpu.memory_space<smem>>
    %260 = arith.index_cast %259 : i32 to index
    %c0_157 = arith.constant 0 : index
    %c0_158 = arith.constant 0 : index
    %261 = vector.load %arg2[%260, %c0_157, %c0_158] : memref<65x1x128xf32, #tpu.memory_space<vmem>>, vector<1x1x128xf32>
    %262 = vector.shape_cast %261 : vector<1x1x128xf32> to vector<1x128xf32>
    %c8_i32_159 = arith.constant 8 : i32
    %263 = arith.muli %arg0, %c8_i32_159 : i32
    %c4_i32_160 = arith.constant 4 : i32
    %264 = arith.addi %263, %c4_i32_160 : i32
    %265 = arith.index_cast %264 : i32 to index
    %c1_161 = arith.constant 1 : index
    %266 = memref.load %arg1[%265, %c1_161] : memref<8x8xi32, #tpu.memory_space<smem>>
    %267 = arith.index_cast %266 : i32 to index
    %c0_162 = arith.constant 0 : index
    %c0_163 = arith.constant 0 : index
    %268 = vector.load %arg2[%267, %c0_162, %c0_163] : memref<65x1x128xf32, #tpu.memory_space<vmem>>, vector<1x1x128xf32>
    %269 = vector.shape_cast %268 : vector<1x1x128xf32> to vector<1x128xf32>
    %270 = arith.maximumf %262, %269 : vector<1x128xf32>
    %c8_i32_164 = arith.constant 8 : i32
    %271 = arith.muli %arg0, %c8_i32_164 : i32
    %c4_i32_165 = arith.constant 4 : i32
    %272 = arith.addi %271, %c4_i32_165 : i32
    %273 = arith.index_cast %272 : i32 to index
    %c2_166 = arith.constant 2 : index
    %274 = memref.load %arg1[%273, %c2_166] : memref<8x8xi32, #tpu.memory_space<smem>>
    %275 = arith.index_cast %274 : i32 to index
    %c0_167 = arith.constant 0 : index
    %c0_168 = arith.constant 0 : index
    %276 = vector.load %arg2[%275, %c0_167, %c0_168] : memref<65x1x128xf32, #tpu.memory_space<vmem>>, vector<1x1x128xf32>
    %277 = vector.shape_cast %276 : vector<1x1x128xf32> to vector<1x128xf32>
    %278 = arith.maximumf %270, %277 : vector<1x128xf32>
    %c8_i32_169 = arith.constant 8 : i32
    %279 = arith.muli %arg0, %c8_i32_169 : i32
    %c4_i32_170 = arith.constant 4 : i32
    %280 = arith.addi %279, %c4_i32_170 : i32
    %281 = arith.index_cast %280 : i32 to index
    %c3_171 = arith.constant 3 : index
    %282 = memref.load %arg1[%281, %c3_171] : memref<8x8xi32, #tpu.memory_space<smem>>
    %283 = arith.index_cast %282 : i32 to index
    %c0_172 = arith.constant 0 : index
    %c0_173 = arith.constant 0 : index
    %284 = vector.load %arg2[%283, %c0_172, %c0_173] : memref<65x1x128xf32, #tpu.memory_space<vmem>>, vector<1x1x128xf32>
    %285 = vector.shape_cast %284 : vector<1x1x128xf32> to vector<1x128xf32>
    %286 = arith.maximumf %278, %285 : vector<1x128xf32>
    %c8_i32_174 = arith.constant 8 : i32
    %287 = arith.muli %arg0, %c8_i32_174 : i32
    %c4_i32_175 = arith.constant 4 : i32
    %288 = arith.addi %287, %c4_i32_175 : i32
    %289 = arith.index_cast %288 : i32 to index
    %c4_176 = arith.constant 4 : index
    %290 = memref.load %arg1[%289, %c4_176] : memref<8x8xi32, #tpu.memory_space<smem>>
    %291 = arith.index_cast %290 : i32 to index
    %c0_177 = arith.constant 0 : index
    %c0_178 = arith.constant 0 : index
    %292 = vector.load %arg2[%291, %c0_177, %c0_178] : memref<65x1x128xf32, #tpu.memory_space<vmem>>, vector<1x1x128xf32>
    %293 = vector.shape_cast %292 : vector<1x1x128xf32> to vector<1x128xf32>
    %294 = arith.maximumf %286, %293 : vector<1x128xf32>
    %c8_i32_179 = arith.constant 8 : i32
    %295 = arith.muli %arg0, %c8_i32_179 : i32
    %c4_i32_180 = arith.constant 4 : i32
    %296 = arith.addi %295, %c4_i32_180 : i32
    %297 = arith.index_cast %296 : i32 to index
    %c5_181 = arith.constant 5 : index
    %298 = memref.load %arg1[%297, %c5_181] : memref<8x8xi32, #tpu.memory_space<smem>>
    %299 = arith.index_cast %298 : i32 to index
    %c0_182 = arith.constant 0 : index
    %c0_183 = arith.constant 0 : index
    %300 = vector.load %arg2[%299, %c0_182, %c0_183] : memref<65x1x128xf32, #tpu.memory_space<vmem>>, vector<1x1x128xf32>
    %301 = vector.shape_cast %300 : vector<1x1x128xf32> to vector<1x128xf32>
    %302 = arith.maximumf %294, %301 : vector<1x128xf32>
    %c8_i32_184 = arith.constant 8 : i32
    %303 = arith.muli %arg0, %c8_i32_184 : i32
    %c4_i32_185 = arith.constant 4 : i32
    %304 = arith.addi %303, %c4_i32_185 : i32
    %305 = arith.index_cast %304 : i32 to index
    %c6_186 = arith.constant 6 : index
    %306 = memref.load %arg1[%305, %c6_186] : memref<8x8xi32, #tpu.memory_space<smem>>
    %307 = arith.index_cast %306 : i32 to index
    %c0_187 = arith.constant 0 : index
    %c0_188 = arith.constant 0 : index
    %308 = vector.load %arg2[%307, %c0_187, %c0_188] : memref<65x1x128xf32, #tpu.memory_space<vmem>>, vector<1x1x128xf32>
    %309 = vector.shape_cast %308 : vector<1x1x128xf32> to vector<1x128xf32>
    %310 = arith.maximumf %302, %309 : vector<1x128xf32>
    %c8_i32_189 = arith.constant 8 : i32
    %311 = arith.muli %arg0, %c8_i32_189 : i32
    %c4_i32_190 = arith.constant 4 : i32
    %312 = arith.addi %311, %c4_i32_190 : i32
    %313 = arith.index_cast %312 : i32 to index
    %c7_191 = arith.constant 7 : index
    %314 = memref.load %arg1[%313, %c7_191] : memref<8x8xi32, #tpu.memory_space<smem>>
    %315 = arith.index_cast %314 : i32 to index
    %c0_192 = arith.constant 0 : index
    %c0_193 = arith.constant 0 : index
    %316 = vector.load %arg2[%315, %c0_192, %c0_193] : memref<65x1x128xf32, #tpu.memory_space<vmem>>, vector<1x1x128xf32>
    %317 = vector.shape_cast %316 : vector<1x1x128xf32> to vector<1x128xf32>
    %318 = arith.maximumf %310, %317 : vector<1x128xf32>
    %c4_194 = arith.constant 4 : index
    %c0_195 = arith.constant 0 : index
    %319 = vector.load %arg6[%c4_194, %c0_195] : memref<8x128xf32, #tpu.memory_space<vmem>>, vector<1x128xf32>
    tpu.vector_store %arg6[%c4_194, %c0_195], %318 {strides = array<i32>} : memref<8x128xf32, #tpu.memory_space<vmem>>, vector<1x128xf32>,
    %c8_i32_196 = arith.constant 8 : i32
    %320 = arith.muli %arg0, %c8_i32_196 : i32
    %c5_i32 = arith.constant 5 : i32
    %321 = arith.addi %320, %c5_i32 : i32
    %322 = arith.index_cast %321 : i32 to index
    %c0_197 = arith.constant 0 : index
    %323 = memref.load %arg1[%322, %c0_197] : memref<8x8xi32, #tpu.memory_space<smem>>
    %324 = arith.index_cast %323 : i32 to index
    %c0_198 = arith.constant 0 : index
    %c0_199 = arith.constant 0 : index
    %325 = vector.load %arg2[%324, %c0_198, %c0_199] : memref<65x1x128xf32, #tpu.memory_space<vmem>>, vector<1x1x128xf32>
    %326 = vector.shape_cast %325 : vector<1x1x128xf32> to vector<1x128xf32>
    %c8_i32_200 = arith.constant 8 : i32
    %327 = arith.muli %arg0, %c8_i32_200 : i32
    %c5_i32_201 = arith.constant 5 : i32
    %328 = arith.addi %327, %c5_i32_201 : i32
    %329 = arith.index_cast %328 : i32 to index
    %c1_202 = arith.constant 1 : index
    %330 = memref.load %arg1[%329, %c1_202] : memref<8x8xi32, #tpu.memory_space<smem>>
    %331 = arith.index_cast %330 : i32 to index
    %c0_203 = arith.constant 0 : index
    %c0_204 = arith.constant 0 : index
    %332 = vector.load %arg2[%331, %c0_203, %c0_204] : memref<65x1x128xf32, #tpu.memory_space<vmem>>, vector<1x1x128xf32>
    %333 = vector.shape_cast %332 : vector<1x1x128xf32> to vector<1x128xf32>
    %334 = arith.maximumf %326, %333 : vector<1x128xf32>
    %c8_i32_205 = arith.constant 8 : i32
    %335 = arith.muli %arg0, %c8_i32_205 : i32
    %c5_i32_206 = arith.constant 5 : i32
    %336 = arith.addi %335, %c5_i32_206 : i32
    %337 = arith.index_cast %336 : i32 to index
    %c2_207 = arith.constant 2 : index
    %338 = memref.load %arg1[%337, %c2_207] : memref<8x8xi32, #tpu.memory_space<smem>>
    %339 = arith.index_cast %338 : i32 to index
    %c0_208 = arith.constant 0 : index
    %c0_209 = arith.constant 0 : index
    %340 = vector.load %arg2[%339, %c0_208, %c0_209] : memref<65x1x128xf32, #tpu.memory_space<vmem>>, vector<1x1x128xf32>
    %341 = vector.shape_cast %340 : vector<1x1x128xf32> to vector<1x128xf32>
    %342 = arith.maximumf %334, %341 : vector<1x128xf32>
    %c8_i32_210 = arith.constant 8 : i32
    %343 = arith.muli %arg0, %c8_i32_210 : i32
    %c5_i32_211 = arith.constant 5 : i32
    %344 = arith.addi %343, %c5_i32_211 : i32
    %345 = arith.index_cast %344 : i32 to index
    %c3_212 = arith.constant 3 : index
    %346 = memref.load %arg1[%345, %c3_212] : memref<8x8xi32, #tpu.memory_space<smem>>
    %347 = arith.index_cast %346 : i32 to index
    %c0_213 = arith.constant 0 : index
    %c0_214 = arith.constant 0 : index
    %348 = vector.load %arg2[%347, %c0_213, %c0_214] : memref<65x1x128xf32, #tpu.memory_space<vmem>>, vector<1x1x128xf32>
    %349 = vector.shape_cast %348 : vector<1x1x128xf32> to vector<1x128xf32>
    %350 = arith.maximumf %342, %349 : vector<1x128xf32>
    %c8_i32_215 = arith.constant 8 : i32
    %351 = arith.muli %arg0, %c8_i32_215 : i32
    %c5_i32_216 = arith.constant 5 : i32
    %352 = arith.addi %351, %c5_i32_216 : i32
    %353 = arith.index_cast %352 : i32 to index
    %c4_217 = arith.constant 4 : index
    %354 = memref.load %arg1[%353, %c4_217] : memref<8x8xi32, #tpu.memory_space<smem>>
    %355 = arith.index_cast %354 : i32 to index
    %c0_218 = arith.constant 0 : index
    %c0_219 = arith.constant 0 : index
    %356 = vector.load %arg2[%355, %c0_218, %c0_219] : memref<65x1x128xf32, #tpu.memory_space<vmem>>, vector<1x1x128xf32>
    %357 = vector.shape_cast %356 : vector<1x1x128xf32> to vector<1x128xf32>
    %358 = arith.maximumf %350, %357 : vector<1x128xf32>
    %c8_i32_220 = arith.constant 8 : i32
    %359 = arith.muli %arg0, %c8_i32_220 : i32
    %c5_i32_221 = arith.constant 5 : i32
    %360 = arith.addi %359, %c5_i32_221 : i32
    %361 = arith.index_cast %360 : i32 to index
    %c5_222 = arith.constant 5 : index
    %362 = memref.load %arg1[%361, %c5_222] : memref<8x8xi32, #tpu.memory_space<smem>>
    %363 = arith.index_cast %362 : i32 to index
    %c0_223 = arith.constant 0 : index
    %c0_224 = arith.constant 0 : index
    %364 = vector.load %arg2[%363, %c0_223, %c0_224] : memref<65x1x128xf32, #tpu.memory_space<vmem>>, vector<1x1x128xf32>
    %365 = vector.shape_cast %364 : vector<1x1x128xf32> to vector<1x128xf32>
    %366 = arith.maximumf %358, %365 : vector<1x128xf32>
    %c8_i32_225 = arith.constant 8 : i32
    %367 = arith.muli %arg0, %c8_i32_225 : i32
    %c5_i32_226 = arith.constant 5 : i32
    %368 = arith.addi %367, %c5_i32_226 : i32
    %369 = arith.index_cast %368 : i32 to index
    %c6_227 = arith.constant 6 : index
    %370 = memref.load %arg1[%369, %c6_227] : memref<8x8xi32, #tpu.memory_space<smem>>
    %371 = arith.index_cast %370 : i32 to index
    %c0_228 = arith.constant 0 : index
    %c0_229 = arith.constant 0 : index
    %372 = vector.load %arg2[%371, %c0_228, %c0_229] : memref<65x1x128xf32, #tpu.memory_space<vmem>>, vector<1x1x128xf32>
    %373 = vector.shape_cast %372 : vector<1x1x128xf32> to vector<1x128xf32>
    %374 = arith.maximumf %366, %373 : vector<1x128xf32>
    %c8_i32_230 = arith.constant 8 : i32
    %375 = arith.muli %arg0, %c8_i32_230 : i32
    %c5_i32_231 = arith.constant 5 : i32
    %376 = arith.addi %375, %c5_i32_231 : i32
    %377 = arith.index_cast %376 : i32 to index
    %c7_232 = arith.constant 7 : index
    %378 = memref.load %arg1[%377, %c7_232] : memref<8x8xi32, #tpu.memory_space<smem>>
    %379 = arith.index_cast %378 : i32 to index
    %c0_233 = arith.constant 0 : index
    %c0_234 = arith.constant 0 : index
    %380 = vector.load %arg2[%379, %c0_233, %c0_234] : memref<65x1x128xf32, #tpu.memory_space<vmem>>, vector<1x1x128xf32>
    %381 = vector.shape_cast %380 : vector<1x1x128xf32> to vector<1x128xf32>
    %382 = arith.maximumf %374, %381 : vector<1x128xf32>
    %c5_235 = arith.constant 5 : index
    %c0_236 = arith.constant 0 : index
    %383 = vector.load %arg6[%c5_235, %c0_236] : memref<8x128xf32, #tpu.memory_space<vmem>>, vector<1x128xf32>
    tpu.vector_store %arg6[%c5_235, %c0_236], %382 {strides = array<i32>} : memref<8x128xf32, #tpu.memory_space<vmem>>, vector<1x128xf32>,
    %c8_i32_237 = arith.constant 8 : i32
    %384 = arith.muli %arg0, %c8_i32_237 : i32
    %c6_i32 = arith.constant 6 : i32
    %385 = arith.addi %384, %c6_i32 : i32
    %386 = arith.index_cast %385 : i32 to index
    %c0_238 = arith.constant 0 : index
    %387 = memref.load %arg1[%386, %c0_238] : memref<8x8xi32, #tpu.memory_space<smem>>
    %388 = arith.index_cast %387 : i32 to index
    %c0_239 = arith.constant 0 : index
    %c0_240 = arith.constant 0 : index
    %389 = vector.load %arg2[%388, %c0_239, %c0_240] : memref<65x1x128xf32, #tpu.memory_space<vmem>>, vector<1x1x128xf32>
    %390 = vector.shape_cast %389 : vector<1x1x128xf32> to vector<1x128xf32>
    %c8_i32_241 = arith.constant 8 : i32
    %391 = arith.muli %arg0, %c8_i32_241 : i32
    %c6_i32_242 = arith.constant 6 : i32
    %392 = arith.addi %391, %c6_i32_242 : i32
    %393 = arith.index_cast %392 : i32 to index
    %c1_243 = arith.constant 1 : index
    %394 = memref.load %arg1[%393, %c1_243] : memref<8x8xi32, #tpu.memory_space<smem>>
    %395 = arith.index_cast %394 : i32 to index
    %c0_244 = arith.constant 0 : index
    %c0_245 = arith.constant 0 : index
    %396 = vector.load %arg2[%395, %c0_244, %c0_245] : memref<65x1x128xf32, #tpu.memory_space<vmem>>, vector<1x1x128xf32>
    %397 = vector.shape_cast %396 : vector<1x1x128xf32> to vector<1x128xf32>
    %398 = arith.maximumf %390, %397 : vector<1x128xf32>
    %c8_i32_246 = arith.constant 8 : i32
    %399 = arith.muli %arg0, %c8_i32_246 : i32
    %c6_i32_247 = arith.constant 6 : i32
    %400 = arith.addi %399, %c6_i32_247 : i32
    %401 = arith.index_cast %400 : i32 to index
    %c2_248 = arith.constant 2 : index
    %402 = memref.load %arg1[%401, %c2_248] : memref<8x8xi32, #tpu.memory_space<smem>>
    %403 = arith.index_cast %402 : i32 to index
    %c0_249 = arith.constant 0 : index
    %c0_250 = arith.constant 0 : index
    %404 = vector.load %arg2[%403, %c0_249, %c0_250] : memref<65x1x128xf32, #tpu.memory_space<vmem>>, vector<1x1x128xf32>
    %405 = vector.shape_cast %404 : vector<1x1x128xf32> to vector<1x128xf32>
    %406 = arith.maximumf %398, %405 : vector<1x128xf32>
    %c8_i32_251 = arith.constant 8 : i32
    %407 = arith.muli %arg0, %c8_i32_251 : i32
    %c6_i32_252 = arith.constant 6 : i32
    %408 = arith.addi %407, %c6_i32_252 : i32
    %409 = arith.index_cast %408 : i32 to index
    %c3_253 = arith.constant 3 : index
    %410 = memref.load %arg1[%409, %c3_253] : memref<8x8xi32, #tpu.memory_space<smem>>
    %411 = arith.index_cast %410 : i32 to index
    %c0_254 = arith.constant 0 : index
    %c0_255 = arith.constant 0 : index
    %412 = vector.load %arg2[%411, %c0_254, %c0_255] : memref<65x1x128xf32, #tpu.memory_space<vmem>>, vector<1x1x128xf32>
    %413 = vector.shape_cast %412 : vector<1x1x128xf32> to vector<1x128xf32>
    %414 = arith.maximumf %406, %413 : vector<1x128xf32>
    %c8_i32_256 = arith.constant 8 : i32
    %415 = arith.muli %arg0, %c8_i32_256 : i32
    %c6_i32_257 = arith.constant 6 : i32
    %416 = arith.addi %415, %c6_i32_257 : i32
    %417 = arith.index_cast %416 : i32 to index
    %c4_258 = arith.constant 4 : index
    %418 = memref.load %arg1[%417, %c4_258] : memref<8x8xi32, #tpu.memory_space<smem>>
    %419 = arith.index_cast %418 : i32 to index
    %c0_259 = arith.constant 0 : index
    %c0_260 = arith.constant 0 : index
    %420 = vector.load %arg2[%419, %c0_259, %c0_260] : memref<65x1x128xf32, #tpu.memory_space<vmem>>, vector<1x1x128xf32>
    %421 = vector.shape_cast %420 : vector<1x1x128xf32> to vector<1x128xf32>
    %422 = arith.maximumf %414, %421 : vector<1x128xf32>
    %c8_i32_261 = arith.constant 8 : i32
    %423 = arith.muli %arg0, %c8_i32_261 : i32
    %c6_i32_262 = arith.constant 6 : i32
    %424 = arith.addi %423, %c6_i32_262 : i32
    %425 = arith.index_cast %424 : i32 to index
    %c5_263 = arith.constant 5 : index
    %426 = memref.load %arg1[%425, %c5_263] : memref<8x8xi32, #tpu.memory_space<smem>>
    %427 = arith.index_cast %426 : i32 to index
    %c0_264 = arith.constant 0 : index
    %c0_265 = arith.constant 0 : index
    %428 = vector.load %arg2[%427, %c0_264, %c0_265] : memref<65x1x128xf32, #tpu.memory_space<vmem>>, vector<1x1x128xf32>
    %429 = vector.shape_cast %428 : vector<1x1x128xf32> to vector<1x128xf32>
    %430 = arith.maximumf %422, %429 : vector<1x128xf32>
    %c8_i32_266 = arith.constant 8 : i32
    %431 = arith.muli %arg0, %c8_i32_266 : i32
    %c6_i32_267 = arith.constant 6 : i32
    %432 = arith.addi %431, %c6_i32_267 : i32
    %433 = arith.index_cast %432 : i32 to index
    %c6_268 = arith.constant 6 : index
    %434 = memref.load %arg1[%433, %c6_268] : memref<8x8xi32, #tpu.memory_space<smem>>
    %435 = arith.index_cast %434 : i32 to index
    %c0_269 = arith.constant 0 : index
    %c0_270 = arith.constant 0 : index
    %436 = vector.load %arg2[%435, %c0_269, %c0_270] : memref<65x1x128xf32, #tpu.memory_space<vmem>>, vector<1x1x128xf32>
    %437 = vector.shape_cast %436 : vector<1x1x128xf32> to vector<1x128xf32>
    %438 = arith.maximumf %430, %437 : vector<1x128xf32>
    %c8_i32_271 = arith.constant 8 : i32
    %439 = arith.muli %arg0, %c8_i32_271 : i32
    %c6_i32_272 = arith.constant 6 : i32
    %440 = arith.addi %439, %c6_i32_272 : i32
    %441 = arith.index_cast %440 : i32 to index
    %c7_273 = arith.constant 7 : index
    %442 = memref.load %arg1[%441, %c7_273] : memref<8x8xi32, #tpu.memory_space<smem>>
    %443 = arith.index_cast %442 : i32 to index
    %c0_274 = arith.constant 0 : index
    %c0_275 = arith.constant 0 : index
    %444 = vector.load %arg2[%443, %c0_274, %c0_275] : memref<65x1x128xf32, #tpu.memory_space<vmem>>, vector<1x1x128xf32>
    %445 = vector.shape_cast %444 : vector<1x1x128xf32> to vector<1x128xf32>
    %446 = arith.maximumf %438, %445 : vector<1x128xf32>
    %c6_276 = arith.constant 6 : index
    %c0_277 = arith.constant 0 : index
    %447 = vector.load %arg6[%c6_276, %c0_277] : memref<8x128xf32, #tpu.memory_space<vmem>>, vector<1x128xf32>
    tpu.vector_store %arg6[%c6_276, %c0_277], %446 {strides = array<i32>} : memref<8x128xf32, #tpu.memory_space<vmem>>, vector<1x128xf32>,
    %c8_i32_278 = arith.constant 8 : i32
    %448 = arith.muli %arg0, %c8_i32_278 : i32
    %c7_i32 = arith.constant 7 : i32
    %449 = arith.addi %448, %c7_i32 : i32
    %450 = arith.index_cast %449 : i32 to index
    %c0_279 = arith.constant 0 : index
    %451 = memref.load %arg1[%450, %c0_279] : memref<8x8xi32, #tpu.memory_space<smem>>
    %452 = arith.index_cast %451 : i32 to index
    %c0_280 = arith.constant 0 : index
    %c0_281 = arith.constant 0 : index
    %453 = vector.load %arg2[%452, %c0_280, %c0_281] : memref<65x1x128xf32, #tpu.memory_space<vmem>>, vector<1x1x128xf32>
    %454 = vector.shape_cast %453 : vector<1x1x128xf32> to vector<1x128xf32>
    %c8_i32_282 = arith.constant 8 : i32
    %455 = arith.muli %arg0, %c8_i32_282 : i32
    %c7_i32_283 = arith.constant 7 : i32
    %456 = arith.addi %455, %c7_i32_283 : i32
    %457 = arith.index_cast %456 : i32 to index
    %c1_284 = arith.constant 1 : index
    %458 = memref.load %arg1[%457, %c1_284] : memref<8x8xi32, #tpu.memory_space<smem>>
    %459 = arith.index_cast %458 : i32 to index
    %c0_285 = arith.constant 0 : index
    %c0_286 = arith.constant 0 : index
    %460 = vector.load %arg2[%459, %c0_285, %c0_286] : memref<65x1x128xf32, #tpu.memory_space<vmem>>, vector<1x1x128xf32>
    %461 = vector.shape_cast %460 : vector<1x1x128xf32> to vector<1x128xf32>
    %462 = arith.maximumf %454, %461 : vector<1x128xf32>
    %c8_i32_287 = arith.constant 8 : i32
    %463 = arith.muli %arg0, %c8_i32_287 : i32
    %c7_i32_288 = arith.constant 7 : i32
    %464 = arith.addi %463, %c7_i32_288 : i32
    %465 = arith.index_cast %464 : i32 to index
    %c2_289 = arith.constant 2 : index
    %466 = memref.load %arg1[%465, %c2_289] : memref<8x8xi32, #tpu.memory_space<smem>>
    %467 = arith.index_cast %466 : i32 to index
    %c0_290 = arith.constant 0 : index
    %c0_291 = arith.constant 0 : index
    %468 = vector.load %arg2[%467, %c0_290, %c0_291] : memref<65x1x128xf32, #tpu.memory_space<vmem>>, vector<1x1x128xf32>
    %469 = vector.shape_cast %468 : vector<1x1x128xf32> to vector<1x128xf32>
    %470 = arith.maximumf %462, %469 : vector<1x128xf32>
    %c8_i32_292 = arith.constant 8 : i32
    %471 = arith.muli %arg0, %c8_i32_292 : i32
    %c7_i32_293 = arith.constant 7 : i32
    %472 = arith.addi %471, %c7_i32_293 : i32
    %473 = arith.index_cast %472 : i32 to index
    %c3_294 = arith.constant 3 : index
    %474 = memref.load %arg1[%473, %c3_294] : memref<8x8xi32, #tpu.memory_space<smem>>
    %475 = arith.index_cast %474 : i32 to index
    %c0_295 = arith.constant 0 : index
    %c0_296 = arith.constant 0 : index
    %476 = vector.load %arg2[%475, %c0_295, %c0_296] : memref<65x1x128xf32, #tpu.memory_space<vmem>>, vector<1x1x128xf32>
    %477 = vector.shape_cast %476 : vector<1x1x128xf32> to vector<1x128xf32>
    %478 = arith.maximumf %470, %477 : vector<1x128xf32>
    %c8_i32_297 = arith.constant 8 : i32
    %479 = arith.muli %arg0, %c8_i32_297 : i32
    %c7_i32_298 = arith.constant 7 : i32
    %480 = arith.addi %479, %c7_i32_298 : i32
    %481 = arith.index_cast %480 : i32 to index
    %c4_299 = arith.constant 4 : index
    %482 = memref.load %arg1[%481, %c4_299] : memref<8x8xi32, #tpu.memory_space<smem>>
    %483 = arith.index_cast %482 : i32 to index
    %c0_300 = arith.constant 0 : index
    %c0_301 = arith.constant 0 : index
    %484 = vector.load %arg2[%483, %c0_300, %c0_301] : memref<65x1x128xf32, #tpu.memory_space<vmem>>, vector<1x1x128xf32>
    %485 = vector.shape_cast %484 : vector<1x1x128xf32> to vector<1x128xf32>
    %486 = arith.maximumf %478, %485 : vector<1x128xf32>
    %c8_i32_302 = arith.constant 8 : i32
    %487 = arith.muli %arg0, %c8_i32_302 : i32
    %c7_i32_303 = arith.constant 7 : i32
    %488 = arith.addi %487, %c7_i32_303 : i32
    %489 = arith.index_cast %488 : i32 to index
    %c5_304 = arith.constant 5 : index
    %490 = memref.load %arg1[%489, %c5_304] : memref<8x8xi32, #tpu.memory_space<smem>>
    %491 = arith.index_cast %490 : i32 to index
    %c0_305 = arith.constant 0 : index
    %c0_306 = arith.constant 0 : index
    %492 = vector.load %arg2[%491, %c0_305, %c0_306] : memref<65x1x128xf32, #tpu.memory_space<vmem>>, vector<1x1x128xf32>
    %493 = vector.shape_cast %492 : vector<1x1x128xf32> to vector<1x128xf32>
    %494 = arith.maximumf %486, %493 : vector<1x128xf32>
    %c8_i32_307 = arith.constant 8 : i32
    %495 = arith.muli %arg0, %c8_i32_307 : i32
    %c7_i32_308 = arith.constant 7 : i32
    %496 = arith.addi %495, %c7_i32_308 : i32
    %497 = arith.index_cast %496 : i32 to index
    %c6_309 = arith.constant 6 : index
    %498 = memref.load %arg1[%497, %c6_309] : memref<8x8xi32, #tpu.memory_space<smem>>
    %499 = arith.index_cast %498 : i32 to index
    %c0_310 = arith.constant 0 : index
    %c0_311 = arith.constant 0 : index
    %500 = vector.load %arg2[%499, %c0_310, %c0_311] : memref<65x1x128xf32, #tpu.memory_space<vmem>>, vector<1x1x128xf32>
    %501 = vector.shape_cast %500 : vector<1x1x128xf32> to vector<1x128xf32>
    %502 = arith.maximumf %494, %501 : vector<1x128xf32>
    %c8_i32_312 = arith.constant 8 : i32
    %503 = arith.muli %arg0, %c8_i32_312 : i32
    %c7_i32_313 = arith.constant 7 : i32
    %504 = arith.addi %503, %c7_i32_313 : i32
    %505 = arith.index_cast %504 : i32 to index
    %c7_314 = arith.constant 7 : index
    %506 = memref.load %arg1[%505, %c7_314] : memref<8x8xi32, #tpu.memory_space<smem>>
    %507 = arith.index_cast %506 : i32 to index
    %c0_315 = arith.constant 0 : index
    %c0_316 = arith.constant 0 : index
    %508 = vector.load %arg2[%507, %c0_315, %c0_316] : memref<65x1x128xf32, #tpu.memory_space<vmem>>, vector<1x1x128xf32>
    %509 = vector.shape_cast %508 : vector<1x1x128xf32> to vector<1x128xf32>
    %510 = arith.maximumf %502, %509 : vector<1x128xf32>
    %c7_317 = arith.constant 7 : index
    %c0_318 = arith.constant 0 : index
    %511 = vector.load %arg6[%c7_317, %c0_318] : memref<8x128xf32, #tpu.memory_space<vmem>>, vector<1x128xf32>
    tpu.vector_store %arg6[%c7_317, %c0_318], %510 {strides = array<i32>} : memref<8x128xf32, #tpu.memory_space<vmem>>, vector<1x128xf32>,
    %c0_319 = arith.constant 0 : index
    %c0_320 = arith.constant 0 : index
    %512 = vector.load %arg6[%c0_319, %c0_320] : memref<8x128xf32, #tpu.memory_space<vmem>>, vector<8x128xf32>
    %c0_321 = arith.constant 0 : index
    %c0_322 = arith.constant 0 : index
    %513 = vector.load %arg3[%c0_321, %c0_322] : memref<128x128xf32, #tpu.memory_space<vmem>>, vector<128x128xf32>
    %cst = arith.constant dense<0.000000e+00> : vector<8x128xf32>
    %514 = tpu.matmul %512, %513, %cst {dimension_numbers = #tpu.dot_dimension_numbers<[1], [0], [0], [1], [0, 0, 1, 1], [], []>} : vector<8x128xf32>, vector<128x128xf32>, vector<8x128xf32> -> vector<8x128xf32>
    %c0_323 = arith.constant 0 : index
    %c0_324 = arith.constant 0 : index
    %515 = vector.load %arg4[%c0_323, %c0_324] : memref<1x128xf32, #tpu.memory_space<vmem>>, vector<1x128xf32>
    %516 = vector.broadcast %515 : vector<1x128xf32> to vector<8x128xf32>
    %517 = arith.addf %514, %516 : vector<8x128xf32>
    %c0_325 = arith.constant 0 : index
    %c0_326 = arith.constant 0 : index
    %518 = vector.load %arg5[%c0_325, %c0_326] : memref<8x128xf32, #tpu.memory_space<vmem>>, vector<8x128xf32>
    tpu.vector_store %arg5[%c0_325, %c0_326], %517 {strides = array<i32>} : memref<8x128xf32, #tpu.memory_space<vmem>>, vector<8x128xf32>,
    return
  }
  func.func @transform_0(%arg0: i32, %arg1: memref<8x8xi32, #tpu.memory_space<smem>>) -> (i32, i32, i32) {
    %c0_i32 = arith.constant 0 : i32
    %c0_i32_0 = arith.constant 0 : i32
    %c0_i32_1 = arith.constant 0 : i32
    %c0_i32_2 = arith.constant 0 : i32
    return %c0_i32, %c0_i32_0, %c0_i32_1 : i32, i32, i32
  }
  func.func @transform_1(%arg0: i32, %arg1: memref<8x8xi32, #tpu.memory_space<smem>>) -> (i32, i32) {
    %c0_i32 = arith.constant 0 : i32
    %c0_i32_0 = arith.constant 0 : i32
    %c0_i32_1 = arith.constant 0 : i32
    return %c0_i32, %c0_i32_0 : i32, i32
  }
  func.func @transform_2(%arg0: i32, %arg1: memref<8x8xi32, #tpu.memory_space<smem>>) -> (i32, i32) {
    %c0_i32 = arith.constant 0 : i32
    %c0_i32_0 = arith.constant 0 : i32
    %c0_i32_1 = arith.constant 0 : i32
    return %c0_i32, %c0_i32_0 : i32, i32
  }
  func.func @transform_3(%arg0: i32, %arg1: memref<8x8xi32, #tpu.memory_space<smem>>) -> (i32, i32) {
    %c0_i32 = arith.constant 0 : i32
    %c0_i32_0 = arith.constant 0 : i32
    return %arg0, %c0_i32 : i32, i32
  }
}

</mosaic_0001>

<bundles_post_ra>
// kernel: tpu_custom_call.1
= control target key start
LH: loop header
LB: loop body
LE: loop exit
PB: predicated region body
PF: predicated region fallthrough
CT: control target
= control target key end

     0   :  { %s1016_s0 = inlined_call_operand.hbm [shape: s32[8,8], index: 0, kind: input, shape index: {}]   ;;  %s1017_s1 = inlined_call_operand.hbm [shape: f32[65,1,128], index: 1, kind: input, shape index: {}]   ;;  %s1018_s2 = inlined_call_operand.hbm [shape: f32[128,128], index: 2, kind: input, shape index: {}]   ;;  %s1019_s3 = inlined_call_operand.vmem [shape: f32[1,128], index: 3, kind: input, shape index: {}]   ;;  %s1020_s4 = inlined_call_operand.hbm [shape: f32[8,128], index: 4, kind: output, shape index: {}]  }
   0x1   :  { %s702_s17 = scalar_lea.hbm %s1016_s0, 128 }
   0x2   :  { %p703_p0 = scmp.ne.s32.totalorder %s1016_s0, %s702_s17  ;;  %p706_p1 = scmp.lt.u32.totalorder %s702_s17, %s1016_s0 }
   0x4   :  { %p708_p2 = pnand %p706_p1, %p703_p0 }
   0x6   :  { %711 = shalt.err (!%p708_p2)  }
   0x7   :  { %s786_s22 = smov [#allocation4]  }
   0x8   :  { %10 = dma.hbm_to_smem %s1016_s0, 128, %s786_s22, [#allocation3] }
   0x9   :  { %778 = dma.done.wait [#allocation3], 128 }
   0xa   :  { %779 = vsyncadd [#allocation3], 4294967168 }
   0xb   :  { %12 = sfence }
   0xc   :  { %13 = vsyncpa [#allocation6], 0 }
   0xd   :  { %14 = vsyncpa [#allocation9], 0 }
   0xe   :  { %15 = vsyncpa [#allocation7], 0  ;;  %s787_s25 = smov [#allocation5]   ;;  %s712_s29 = scalar_lea.hbm %s1017_s1, 1040 }
   0xf   :  { %s21_s26 = sshll.u32 %s787_s25, 4  ;;  %p713_p3 = scmp.ne.s32.totalorder %s1017_s1, %s712_s29  ;;  %s22_s26 = int_to_ptr.vmem [resolvable:$true] %s21_s26 }
  0x10   :  { %p716_p4 = scmp.lt.u32.totalorder %s712_s29, %s1017_s1 }
  0x12   :  { %p718_p5 = pnand %p716_p4, %p713_p3 }
  0x14   :  { %721 = shalt.err (!%p718_p5)
}
  0x15   :  { %s722_s0 = scalar_lea.vmem %s22_s26, 1040  ;;  %s726_s8 = scalar_lea.vmem %s22_s26, 1056 }
  0x16   :  { %p723_p6 = scmp.ne.s32.totalorder %s22_s26, %s722_s0  ;;  %p727_p7 = scmp.lt.s32.totalorder %s22_s26, %s22_s26 }
  0x17   :  { %p728_p8 = scmp.lt.s32.totalorder %s726_s8, %s722_s0 }
  0x19   :  { %p729_p9 = por %p728_p8, %p727_p7 }
  0x1b   :  { %p730_p10 = pnand %p729_p9, %p723_p6 }
  0x1d   :  { %733 = shalt.err (!%p730_p10)
}
  0x1e   :  { %s788_s9 = smov 16   ;;  %s789_s10 = smov 1  }
  0x1f   :  { %27 = dma.hbm_to_vmem [thread:$0]  %s1017_s1, 1040, %s22_s26, [#allocation6], %s788_s9, %s788_s9, %s789_s10  }
  0x20   :  { %s790_s13 = smov [#allocation8]   ;;  %s734_s17 = scalar_lea.hbm %s1018_s2, 2048 }
  0x21   :  { %s33_s14 = sshll.u32 %s790_s13, 4  ;;  %p735_p11 = scmp.ne.s32.totalorder %s1018_s2, %s734_s17  ;;  %s34_s14 = int_to_ptr.vmem [resolvable:$true] %s33_s14 }
  0x22   :  { %p738_p12 = scmp.lt.u32.totalorder %s734_s17, %s1018_s2 }
  0x24   :  { %p740_p13 = pnand %p738_p12, %p735_p11 }
  0x26   :  { %743 = shalt.err (!%p740_p13)
}
  0x27   :  { %s744_s22 = scalar_lea.vmem %s34_s14, 2048  ;;  %p749_p1 = scmp.lt.s32.totalorder %s34_s14, %s34_s14 }
  0x28   :  { %p745_p0 = scmp.ne.s32.totalorder %s34_s14, %s744_s22  ;;  %p750_p2 = scmp.lt.s32.totalorder %s744_s22, %s744_s22 }
  0x2a   :  { %p751_p3 = por %p750_p2, %p749_p1 }
  0x2c   :  { %p752_p4 = pnand %p751_p3, %p745_p0 }
  0x2e   :  { %755 = shalt.err (!%p752_p4)
}
  0x2f   :  { %s791_s1 = smov 128   ;;  %s792_s23 = smov 8  }
  0x30   :  { %39 = dma.hbm_to_vmem [thread:$0]  %s1018_s2, 2048, %s34_s14, [#allocation9], %s791_s1, %s791_s1, %s792_s23  }
  0x31   :  { %780 = dma.done.wait [#allocation6], 1040  }
  0x32   :  { %781 = vsyncadd [#allocation6], 4294966256 }
  0x33   :  { %782 = dma.done.wait [#allocation9], 2048  }
  0x34   :  { %783 = vsyncadd [#allocation9], 4294965248  ;;  %v793_v0 = vmov 0.0|0.0   ;;  %vm794_vm0 = vmmov 0   ;;  %v795_v1 = vmov 0.0   ;;  %s50_s26 = sld [smem:[#allocation4]] }
  0x35   :  { %667 = vmatprep.subr.bf16.mxu0 %v793_v0  ;;  %664 = vmatprep.mubr.msk.f32.mxu0 %vm794_vm0, %v795_v1  ;;  %s551_s27 = sld [smem:[#allocation4 + $0x1]]  ;;  %s552_s28 = sld [smem:[#allocation4 + $0x2]]  ;;  %v377_v2 = vld [vmem:[#allocation8] sm:$0xff]  ;;  %v378_v3 = vld [vmem:[#allocation8 + $0x8] sm:$0xff]  ;;  %v379_v4 = vld [vmem:[#allocation8 + $0x10] sm:$0xff] }
  0x36   :  { %s859_s29 = sld [smem:[#allocation4 + $0x3]]  ;;  %s861_s30 = sld [smem:[#allocation4 + $0x4]]  ;;  %v668_v5 = vpack.c.bf16 %v378_v3, %v377_v2  ;;  %v380_v6 = vld [vmem:[#allocation8 + $0x18] sm:$0xff]  ;;  %v381_v8 = vld [vmem:[#allocation8 + $0x20] sm:$0xff]  ;;  %v382_v9 = vld [vmem:[#allocation8 + $0x28] sm:$0xff] }
  0x37   :  { %s863_s5 = sld [smem:[#allocation4 + $0x5]]  ;;  %s865_s2 = sld [smem:[#allocation4 + $0x6]]  ;;  %v671_v7 = vpack.c.bf16 %v380_v6, %v379_v4  ;;  %v674_v14 = vpack.c.bf16 %v382_v9, %v381_v8  ;;  %v383_v15 = vld [vmem:[#allocation8 + $0x30] sm:$0xff]  ;;  %v384_v16 = vld [vmem:[#allocation8 + $0x38] sm:$0xff]  ;;  %v385_v29 = vld [vmem:[#allocation8 + $0x40] sm:$0xff] }
  0x38   :  { %s867_s6 = sld [smem:[#allocation4 + $0x80]]  ;;  %s869_s7 = sld [smem:[#allocation4 + $0x81]]  ;;  %669 = vmatpush3.bf16.msra.mxu0 %v668_v5  ;;  %v677_v26 = vpack.c.bf16 %v384_v16, %v383_v15  ;;  %v386_v30 = vld [vmem:[#allocation8 + $0x48] sm:$0xff]  ;;  %v387_v37 = vld [vmem:[#allocation8 + $0x50] sm:$0xff]  ;;  %v388_v38 = vld [vmem:[#allocation8 + $0x58] sm:$0xff] }
  0x39   :  { %s871_s0 = sld [smem:[#allocation4 + $0x7]]  ;;  %s873_s8 = sld [smem:[#allocation4 + $0x82]]  ;;  %670 = vmatprep.subr.bf16.mxu0 %v793_v0  ;;  %v680_v35 = vpack.c.bf16 %v386_v30, %v385_v29  ;;  %v683_v46 = vpack.c.bf16 %v388_v38, %v387_v37  ;;  %v389_v50 = vld [vmem:[#allocation8 + $0x60] sm:$0xff]  ;;  %v390_v51 = vld [vmem:[#allocation8 + $0x68] sm:$0xff]  ;;  %v391_v60 = vld [vmem:[#allocation8 + $0x70] sm:$0xff] }
  0x3a   :  { %s875_s9 = sld [smem:[#allocation4 + $0x83]]  ;;  %s51_s10 = scalar_lea.vmem [#allocation5], %s50_s26  ;;  %v686_v57 = vpack.c.bf16 %v390_v51, %v389_v50  ;;  %v392_v61 = vld [vmem:[#allocation8 + $0x78] sm:$0xff] }
  0x3b   :  { %v52_v10 = vld [vmem:[%s51_s10] sm:$0x1]  ;;  %s55_s11 = scalar_lea.vmem [#allocation5], %s551_s27  ;;  %s60_s12 = scalar_lea.vmem [#allocation5], %s552_s28  ;;  %v689_v2 = vpack.c.bf16 %v392_v61, %v391_v60 }
  0x3c   :  { %v56_v11 = vld [vmem:[%s55_s11] sm:$0x1]  ;;  %672 = vmatpush3.bf16.msra.mxu0 %v671_v7  ;;  %s65_s13 = scalar_lea.vmem [#allocation5], %s859_s29  ;;  %s70_s17 = scalar_lea.vmem [#allocation5], %s861_s30 }
  0x3d   :  { %v57_v12 = vmax.f32 %v52_v10, %v56_v11  ;;  %v61_v13 = vld [vmem:[%s60_s12] sm:$0x1]  ;;  %673 = vmatprep.subr.bf16.mxu0 %v793_v0  ;;  %s884_s18 = sld [smem:[#allocation4 + $0x84]]  ;;  %s887_s20 = sld [smem:[#allocation4 + $0x85]] }
  0x3e   :  { %v66_v17 = vld [vmem:[%s65_s13] sm:$0x1]  ;;  %s92_s14 = scalar_lea.vmem [#allocation5], %s867_s6  ;;  %s96_s15 = scalar_lea.vmem [#allocation5], %s869_s7 }
  0x3f   :  { %v62_v18 = vmax.f32 %v57_v12, %v61_v13  ;;  %v93_v19 = vld [vmem:[%s92_s14] sm:$0x1]  ;;  %s101_s16 = scalar_lea.vmem [#allocation5], %s873_s8  ;;  %s889_s21 = sld [smem:[#allocation4 + $0x86]] }
  0x40   :  { %v97_v20 = vld [vmem:[%s96_s15] sm:$0x1]  ;;  %s106_s19 = scalar_lea.vmem [#allocation5], %s875_s9  ;;  %675 = vmatpush3.bf16.msra.mxu0 %v674_v14  ;;  %s75_s22 = scalar_lea.vmem [#allocation5], %s863_s5 }
  0x41   :  { %v102_v21 = vld [vmem:[%s101_s16] sm:$0x1]  ;;  %v98_v23 = vmax.f32 %v93_v19, %v97_v20  ;;  %v67_v24 = vmax.f32 %v62_v18, %v66_v17  ;;  %s892_s1 = sld [smem:[#allocation4 + $0x87]]  ;;  %s894_s23 = sld [smem:[#allocation4 + $0x100]]  ;;  %676 = vmatprep.subr.bf16.mxu0 %v793_v0 }
  0x42   :  { %v71_v22 = vld [vmem:[%s70_s17] sm:$0x1]  ;;  %s897_s24 = sld [smem:[#allocation4 + $0x101]]  ;;  %s899_s25 = sld [smem:[#allocation4 + $0x102]] }
  0x43   :  { %v107_v25 = vld [vmem:[%s106_s19] sm:$0x1]  ;;  %v103_v28 = vmax.f32 %v98_v23, %v102_v21  ;;  %v72_v31 = vmax.f32 %v67_v24, %v71_v22  ;;  %s80_s26 = scalar_lea.vmem [#allocation5], %s865_s2  ;;  %s902_s27 = sld [smem:[#allocation4 + $0x103]] }
  0x44   :  { %v76_v27 = vld [vmem:[%s75_s22] sm:$0x1]  ;;  %s904_s28 = sld [smem:[#allocation4 + $0x104]]  ;;  %s906_s29 = sld [smem:[#allocation4 + $0x105]]  ;;  %678 = vmatpush3.bf16.msra.mxu0 %v677_v26 }
  0x45   :  { %v81_v32 = vld [vmem:[%s80_s26] sm:$0x1]  ;;  %v108_v33 = vmax.f32 %v103_v28, %v107_v25  ;;  %v77_v34 = vmax.f32 %v72_v31, %v76_v27  ;;  %s908_s30 = sld [smem:[#allocation4 + $0x106]]  ;;  %s85_s5 = scalar_lea.vmem [#allocation5], %s871_s0  ;;  %679 = vmatprep.subr.bf16.mxu0 %v793_v0 }
  0x46   :  { %v86_v36 = vld [vmem:[%s85_s5] sm:$0x1]  ;;  %s911_s2 = sld [smem:[#allocation4 + $0x107]]  ;;  %s111_s6 = scalar_lea.vmem [#allocation5], %s884_s18 }
  0x47   :  { %v82_v39 = vmax.f32 %v77_v34, %v81_v32  ;;  %v112_v40 = vld [vmem:[%s111_s6] sm:$0x1]  ;;  %s116_s7 = scalar_lea.vmem [#allocation5], %s887_s20  ;;  %s121_s8 = scalar_lea.vmem [#allocation5], %s889_s21 }
  0x48   :  { %v113_v41 = vmax.f32 %v108_v33, %v112_v40  ;;  %v117_v42 = vld [vmem:[%s116_s7] sm:$0x1]  ;;  %s133_s0 = scalar_lea.vmem [#allocation5], %s894_s23  ;;  %681 = vmatpush3.bf16.msra.mxu0 %v680_v35  ;;  %s137_s9 = scalar_lea.vmem [#allocation5], %s897_s24 }
  0x49   :  { %v87_v43 = vmax.f32 %v82_v39, %v86_v36  ;;  %v122_v44 = vld [vmem:[%s121_s8] sm:$0x1]  ;;  %s142_s10 = scalar_lea.vmem [#allocation5], %s899_s25  ;;  %682 = vmatprep.subr.bf16.mxu0 %v793_v0  ;;  %s126_s11 = scalar_lea.vmem [#allocation5], %s892_s1 }
  0x4a   :  { %v134_v45 = vld [vmem:[%s133_s0] sm:$0x1]  ;;  %v118_v47 = vmax.f32 %v113_v41, %v117_v42  ;;  %s147_s12 = scalar_lea.vmem [#allocation5], %s902_s27  ;;  %s923_s13 = sld [smem:[#allocation4 + $0x180]] }
  0x4b   :  { %v138_v48 = vld [vmem:[%s137_s9] sm:$0x1]  ;;  %88 = vst [vmem:[#allocation2] sm:$0x1] %v87_v43  ;;  %s925_s14 = sld [smem:[#allocation4 + $0x181]]  ;;  %s152_s15 = scalar_lea.vmem [#allocation5], %s904_s28 }
  0x4c   :  { %v143_v49 = vld [vmem:[%s142_s10] sm:$0x1]  ;;  %v139_v53 = vmax.f32 %v134_v45, %v138_v48  ;;  %v123_v54 = vmax.f32 %v118_v47, %v122_v44  ;;  %684 = vmatpush3.bf16.msra.mxu0 %v683_v46  ;;  %s928_s16 = sld [smem:[#allocation4 + $0x182]]  ;;  %s930_s17 = sld [smem:[#allocation4 + $0x183]] }
  0x4d   :  { %v127_v52 = vld [vmem:[%s126_s11] sm:$0x1]  ;;  %685 = vmatprep.subr.bf16.mxu0 %v793_v0  ;;  %s933_s18 = sld [smem:[#allocation4 + $0x184]]  ;;  %s935_s19 = sld [smem:[#allocation4 + $0x185]] }
  0x4e   :  { %v148_v55 = vld [vmem:[%s147_s12] sm:$0x1]  ;;  %v144_v56 = vmax.f32 %v139_v53, %v143_v49  ;;  %v128_v58 = vmax.f32 %v123_v54, %v127_v52  ;;  %s157_s20 = scalar_lea.vmem [#allocation5], %s906_s29  ;;  %s938_s21 = sld [smem:[#allocation4 + $0x186]] }
  0x4f   :  { %v153_v59 = vld [vmem:[%s152_s15] sm:$0x1]  ;;  %s940_s22 = sld [smem:[#allocation4 + $0x187]]  ;;  %s942_s1 = sld [smem:[#allocation4 + $0x200]] }
  0x50   :  { %v149_v62 = vmax.f32 %v144_v56, %v148_v55  ;;  %129 = vst [vmem:[#allocation2 + $0x1] sm:$0x1] %v128_v58  ;;  %v158_v63 = vld [vmem:[%s157_s20] sm:$0x1]  ;;  %s944_s23 = sld [smem:[#allocation4 + $0x201]]  ;;  %687 = vmatpush3.bf16.msra.mxu0 %v686_v57  ;;  %s162_s24 = scalar_lea.vmem [#allocation5], %s908_s30 }
  0x51   :  { %v163_v3 = vld [vmem:[%s162_s24] sm:$0x1]  ;;  %s947_s25 = sld [smem:[#allocation4 + $0x202]]  ;;  %s949_s26 = sld [smem:[#allocation4 + $0x203]]  ;;  %688 = vmatprep.subr.bf16.mxu0 %v793_v0 }
  0x52   :  { %v154_v1 = vmax.f32 %v149_v62, %v153_v59  ;;  %s167_s27 = scalar_lea.vmem [#allocation5], %s911_s2  ;;  %s174_s28 = scalar_lea.vmem [#allocation5], %s923_s13 }
  0x53   :  { %v168_v5 = vld [vmem:[%s167_s27] sm:$0x1]  ;;  %s178_s29 = scalar_lea.vmem [#allocation5], %s925_s14  ;;  %s183_s30 = scalar_lea.vmem [#allocation5], %s928_s16 }
  0x54   :  { %v159_v4 = vmax.f32 %v154_v1, %v158_v63  ;;  %v175_v6 = vld [vmem:[%s174_s28] sm:$0x1]  ;;  %690 = vmatpush3.bf16.msra.mxu0 %v689_v2  ;;  %s188_s5 = scalar_lea.vmem [#allocation5], %s930_s17  ;;  %s193_s2 = scalar_lea.vmem [#allocation5], %s933_s18 }
  0x55   :  { %v179_v7 = vld [vmem:[%s178_s29] sm:$0x1]  ;;  %s198_s6 = scalar_lea.vmem [#allocation5], %s935_s19  ;;  %s215_s7 = scalar_lea.vmem [#allocation5], %s942_s1 }
  0x56   :  { %v164_v8 = vmax.f32 %v159_v4, %v163_v3  ;;  %v180_v9 = vmax.f32 %v175_v6, %v179_v7  ;;  %v184_v10 = vld [vmem:[%s183_s30] sm:$0x1]  ;;  %s219_s8 = scalar_lea.vmem [#allocation5], %s944_s23  ;;  %s586_s9 = sld [smem:[#allocation4 + $0x204]] }
  0x57   :  { %v189_v11 = vld [vmem:[%s188_s5] sm:$0x1]  ;;  %s224_s0 = scalar_lea.vmem [#allocation5], %s947_s25  ;;  %s229_s10 = scalar_lea.vmem [#allocation5], %s949_s26 }
  0x58   :  { %v169_v0 = vmax.f32 %v164_v8, %v168_v5  ;;  %v185_v12 = vmax.f32 %v180_v9, %v184_v10  ;;  %v194_v13 = vld [vmem:[%s193_s2] sm:$0x1]  ;;  %s587_s11 = sld [smem:[#allocation4 + $0x205]]  ;;  %s588_s12 = sld [smem:[#allocation4 + $0x206]] }
  0x59   :  { %v199_v14 = vld [vmem:[%s198_s6] sm:$0x1]  ;;  %s963_s13 = sld [smem:[#allocation4 + $0x207]]  ;;  %s590_s14 = sld [smem:[#allocation4 + $0x280]] }
  0x5a   :  { %v216_v15 = vld [vmem:[%s215_s7] sm:$0x1]  ;;  %170 = vst [vmem:[#allocation2 + $0x2] sm:$0x1] %v169_v0  ;;  %v190_v17 = vmax.f32 %v185_v12, %v189_v11  ;;  %s203_s15 = scalar_lea.vmem [#allocation5], %s938_s21  ;;  %s591_s16 = sld [smem:[#allocation4 + $0x281]] }
  0x5b   :  { %v220_v16 = vld [vmem:[%s219_s8] sm:$0x1]  ;;  %s592_s17 = sld [smem:[#allocation4 + $0x282]]  ;;  %s966_s18 = sld [smem:[#allocation4 + $0x283]] }
  0x5c   :  { %v221_v18 = vmax.f32 %v216_v15, %v220_v16  ;;  %v225_v19 = vld [vmem:[%s224_s0] sm:$0x1]  ;;  %v195_v21 = vmax.f32 %v190_v17, %v194_v13  ;;  %s968_s19 = sld [smem:[#allocation4 + $0x284]]  ;;  %s208_s20 = scalar_lea.vmem [#allocation5], %s940_s22 }
  0x5d   :  { %v230_v20 = vld [vmem:[%s229_s10] sm:$0x1]  ;;  %s971_s1 = sld [smem:[#allocation4 + $0x285]]  ;;  %s973_s23 = sld [smem:[#allocation4 + $0x286]] }
  0x5e   :  { %v226_v22 = vmax.f32 %v221_v18, %v225_v19  ;;  %v204_v23 = vld [vmem:[%s203_s15] sm:$0x1]  ;;  %v200_v24 = vmax.f32 %v195_v21, %v199_v14  ;;  %s975_s24 = sld [smem:[#allocation4 + $0x287]]  ;;  %s234_s25 = scalar_lea.vmem [#allocation5], %s586_s9 }
  0x5f   :  { %v209_v26 = vld [vmem:[%s208_s20] sm:$0x1]  ;;  %s239_s21 = scalar_lea.vmem [#allocation5], %s587_s11  ;;  %s244_s26 = scalar_lea.vmem [#allocation5], %s588_s12 }
  0x60   :  { %v231_v25 = vmax.f32 %v226_v22, %v230_v20  ;;  %v205_v27 = vmax.f32 %v200_v24, %v204_v23  ;;  %v235_v28 = vld [vmem:[%s234_s25] sm:$0x1]  ;;  %s256_s27 = scalar_lea.vmem [#allocation5], %s590_s14  ;;  %s260_s22 = scalar_lea.vmem [#allocation5], %s591_s16 }
  0x61   :  { %v240_v31 = vld [vmem:[%s239_s21] sm:$0x1]  ;;  %s265_s28 = scalar_lea.vmem [#allocation5], %s592_s17  ;;  %s249_s29 = scalar_lea.vmem [#allocation5], %s963_s13 }
  0x62   :  { %v210_v29 = vmax.f32 %v205_v27, %v209_v26  ;;  %v236_v30 = vmax.f32 %v231_v25, %v235_v28  ;;  %v245_v32 = vld [vmem:[%s244_s26] sm:$0x1]  ;;  %s270_s30 = scalar_lea.vmem [#allocation5], %s966_s18  ;;  %s598_s5 = sld [smem:[#allocation4 + $0x300]] }
  0x63   :  { %v257_v33 = vld [vmem:[%s256_s27] sm:$0x1]  ;;  %s599_s2 = sld [smem:[#allocation4 + $0x301]]  ;;  %s275_s6 = scalar_lea.vmem [#allocation5], %s968_s19 }
  0x64   :  { %211 = vst [vmem:[#allocation2 + $0x3] sm:$0x1] %v210_v29  ;;  %v241_v34 = vmax.f32 %v236_v30, %v240_v31  ;;  %v261_v35 = vld [vmem:[%s260_s22] sm:$0x1]  ;;  %s600_s7 = sld [smem:[#allocation4 + $0x302]]  ;;  %s601_s8 = sld [smem:[#allocation4 + $0x303]] }
  0x65   :  { %v266_v36 = vld [vmem:[%s265_s28] sm:$0x1]  ;;  %v262_v38 = vmax.f32 %v257_v33, %v261_v35  ;;  %s980_s0 = sld [smem:[#allocation4 + $0x304]]  ;;  %s982_s9 = sld [smem:[#allocation4 + $0x305]] }
  0x66   :  { %v250_v37 = vld [vmem:[%s249_s29] sm:$0x1]  ;;  %v246_v39 = vmax.f32 %v241_v34, %v245_v32  ;;  %s280_s10 = scalar_lea.vmem [#allocation5], %s971_s1  ;;  %s985_s11 = sld [smem:[#allocation4 + $0x306]] }
  0x67   :  { %v271_v40 = vld [vmem:[%s270_s30] sm:$0x1]  ;;  %v267_v41 = vmax.f32 %v262_v38, %v266_v36  ;;  %s987_s12 = sld [smem:[#allocation4 + $0x307]]  ;;  %s606_s13 = sld [smem:[#allocation4 + $0x380]] }
  0x68   :  { %v251_v42 = vmax.f32 %v246_v39, %v250_v37  ;;  %v276_v43 = vld [vmem:[%s275_s6] sm:$0x1]  ;;  %s607_s14 = sld [smem:[#allocation4 + $0x381]]  ;;  %s285_s15 = scalar_lea.vmem [#allocation5], %s973_s23 }
  0x69   :  { %v272_v44 = vmax.f32 %v267_v41, %v271_v40  ;;  %v281_v45 = vld [vmem:[%s280_s10] sm:$0x1]  ;;  %s990_s16 = sld [smem:[#allocation4 + $0x382]]  ;;  %s992_s17 = sld [smem:[#allocation4 + $0x383]] }
  0x6a   :  { %252 = vst [vmem:[#allocation2 + $0x4] sm:$0x1] %v251_v42  ;;  %v286_v47 = vld [vmem:[%s285_s15] sm:$0x1]  ;;  %s290_s18 = scalar_lea.vmem [#allocation5], %s975_s24  ;;  %s297_s19 = scalar_lea.vmem [#allocation5], %s598_s5 }
  0x6b   :  { %v277_v46 = vmax.f32 %v272_v44, %v276_v43  ;;  %v291_v49 = vld [vmem:[%s290_s18] sm:$0x1]  ;;  %s301_s20 = scalar_lea.vmem [#allocation5], %s599_s2  ;;  %s306_s1 = scalar_lea.vmem [#allocation5], %s600_s7 }
  0x6c   :  { %v298_v50 = vld [vmem:[%s297_s19] sm:$0x1]  ;;  %s311_s23 = scalar_lea.vmem [#allocation5], %s601_s8  ;;  %s316_s25 = scalar_lea.vmem [#allocation5], %s980_s0 }
  0x6d   :  { %v282_v48 = vmax.f32 %v277_v46, %v281_v45  ;;  %v302_v51 = vld [vmem:[%s301_s20] sm:$0x1]  ;;  %s321_s21 = scalar_lea.vmem [#allocation5], %s982_s9  ;;  %s338_s24 = scalar_lea.vmem [#allocation5], %s606_s13 }
  0x6e   :  { %v303_v53 = vmax.f32 %v298_v50, %v302_v51  ;;  %v307_v54 = vld [vmem:[%s306_s1] sm:$0x1]  ;;  %s342_s26 = scalar_lea.vmem [#allocation5], %s607_s14  ;;  %s610_s22 = sld [smem:[#allocation4 + $0x384]] }
  0x6f   :  { %v287_v52 = vmax.f32 %v282_v48, %v286_v47  ;;  %v312_v55 = vld [vmem:[%s311_s23] sm:$0x1]  ;;  %s347_s27 = scalar_lea.vmem [#allocation5], %s990_s16  ;;  %s352_s28 = scalar_lea.vmem [#allocation5], %s992_s17 }
  0x70   :  { %v308_v57 = vmax.f32 %v303_v53, %v307_v54  ;;  %v317_v58 = vld [vmem:[%s316_s25] sm:$0x1]  ;;  %s611_s29 = sld [smem:[#allocation4 + $0x385]]  ;;  %s612_s30 = sld [smem:[#allocation4 + $0x386]] }
  0x71   :  { %v292_v56 = vmax.f32 %v287_v52, %v291_v49  ;;  %v322_v59 = vld [vmem:[%s321_s21] sm:$0x1]  ;;  %s613_s5 = sld [smem:[#allocation4 + $0x387]]  ;;  %s326_s2 = scalar_lea.vmem [#allocation5], %s985_s11 }
  0x72   :  { %v339_v60 = vld [vmem:[%s338_s24] sm:$0x1]  ;;  %v313_v62 = vmax.f32 %v308_v57, %v312_v55  ;;  %s331_s6 = scalar_lea.vmem [#allocation5], %s987_s12  ;;  %s796_s12 = smov [#allocation10]  }
  0x73   :  { %v343_v61 = vld [vmem:[%s342_s26] sm:$0x1]  ;;  %293 = vst [vmem:[#allocation2 + $0x5] sm:$0x1] %v292_v56  ;;  %s477_s13 = sshll.u32 %s796_s12, 4  ;;  %s478_s13 = int_to_ptr.vmem [resolvable:$true] %s477_s13 }
  0x74   :  { %v344_v63 = vmax.f32 %v339_v60, %v343_v61  ;;  %v348_v1 = vld [vmem:[%s347_s27] sm:$0x1]  ;;  %v318_v3 = vmax.f32 %v313_v62, %v317_v58  ;;  %s357_s7 = scalar_lea.vmem [#allocation5], %s610_s22  ;;  %s756_s14 = scalar_lea.vmem %s478_s13, 128 }
  0x75   :  { %v353_v2 = vld [vmem:[%s352_s28] sm:$0x1]  ;;  %p757_p5 = scmp.ne.s32.totalorder %s478_s13, %s756_s14  ;;  %p761_p6 = scmp.lt.s32.totalorder %s478_s13, %s478_s13 }
  0x76   :  { %v349_v4 = vmax.f32 %v344_v63, %v348_v1  ;;  %v327_v5 = vld [vmem:[%s326_s2] sm:$0x1]  ;;  %v323_v6 = vmax.f32 %v318_v3, %v322_v59  ;;  %s362_s8 = scalar_lea.vmem [#allocation5], %s611_s29  ;;  %s367_s0 = scalar_lea.vmem [#allocation5], %s612_s30 }
  0x77   :  { %v332_v8 = vld [vmem:[%s331_s6] sm:$0x1]  ;;  %s372_s9 = scalar_lea.vmem [#allocation5], %s613_s5  ;;  %p762_p7 = scmp.lt.s32.totalorder %s756_s14, %s756_s14 }
  0x78   :  { %v354_v7 = vmax.f32 %v349_v4, %v353_v2  ;;  %v328_v9 = vmax.f32 %v323_v6, %v327_v5  ;;  %v358_v10 = vld [vmem:[%s357_s7] sm:$0x1] }
  0x79   :  { %v363_v12 = vld [vmem:[%s362_s8] sm:$0x1]  ;;  %p763_p8 = por %p762_p7, %p761_p6 }
  0x7a   :  { %v333_v11 = vmax.f32 %v328_v9, %v332_v8  ;;  %v359_v0 = vmax.f32 %v354_v7, %v358_v10  ;;  %v368_v13 = vld [vmem:[%s367_s0] sm:$0x1] }
  0x7b   :  { %v373_v15 = vld [vmem:[%s372_s9] sm:$0x1]  ;;  %p764_p9 = pnand %p763_p8, %p757_p5 }
  0x7c   :  { %334 = vst [vmem:[#allocation2 + $0x6] sm:$0x1] %v333_v11  ;;  %v364_v14 = vmax.f32 %v359_v0, %v363_v12  ;;  %v614_v19 = vld [vmem:[%s1019_s3] ss:$0 sm:$0xff] }
  0x7e   :  { %v369_v16 = vmax.f32 %v364_v14, %v368_v13 }
  0x80   :  { %v374_v17 = vmax.f32 %v369_v16, %v373_v15 }
  0x82   :  { %375 = vst [vmem:[#allocation2 + $0x7] sm:$0x1] %v374_v17 }
  0x89   :  { %v376_v18 = vld [vmem:[#allocation2] sm:$0xff] }
  0x8a   :  { %665 = vmatmul.mubr.f32.vlgmr.msra.gmra.mrb[0].mxu0 %v376_v18 }
 0x15d   :  { %v466_v20 = vpop.f32.mrb[0].mxu0 }
 0x15e   :  { %v467_v21 = vadd.f32 %v614_v19, %v466_v20  ;;  %v666_v22 = vpop.f32.mrb[1].mxu0 }
 0x160   :  { %470 = vst [vmem:[#allocation10] sm:$0xff] %v467_v21 }
 0x161   :  { %767 = shalt.err (!%p764_p9)
}
 0x162   :  { %s768_s17 = scalar_lea.hbm %s1020_s4, 128 }
 0x163   :  { %p769_p10 = scmp.ne.s32.totalorder %s1020_s4, %s768_s17  ;;  %p772_p11 = scmp.lt.u32.totalorder %s768_s17, %s1020_s4 }
 0x165   :  { %p774_p12 = pnand %p772_p11, %p769_p10 }
 0x167   :  { %777 = shalt.err (!%p774_p12)
}
 0x168   :  { %480 = dma.vmem_to_hbm [thread:$0]  %s478_s13, 128, %s1020_s4, [#allocation7]  }
 0x169   :  { %784 = dma.done.wait [#allocation7], 128  }
 0x16a   :  { %785 = vsyncadd [#allocation7], 4294967168 }
 0x16b   :  { %484 = vsyncpa [#allocation6], 1 }
 0x16c   :  { %485 = vsyncpa [#allocation9], 1 }
 0x16d   :  { %486 = vsyncpa [#allocation7], 1 }

</bundles_post_ra>
